<compile_context>
chip_gen: v7x
topology: tpu7x:2x2x1
jax: 0.10.0
libtpu: 0.0.40
codegen_flags: <defaults>
</compile_context>

<pallas_src>
import functools
import math

import jax
import jax.numpy as jnp
from jax.experimental import pallas as pl
from jax.experimental.pallas import tpu as pltpu


def _layer_norm(x, gamma, beta, eps=1e-5):
    mu = jnp.mean(x, axis=-1, keepdims=True)
    var = jnp.mean((x - mu) ** 2, axis=-1, keepdims=True)
    return (x - mu) * jax.lax.rsqrt(var + eps) * gamma + beta


def _encoder_layer_kernel(x_ref, mask_ref,
                          wq_ref, bq_ref, wk_ref, bk_ref, wv_ref, bv_ref,
                          wo_ref, bo_ref, g1_ref, be1_ref,
                          w1_ref, b1_ref, w2_ref, b2_ref, g2_ref, be2_ref,
                          out_ref, *, heads, head_size, out_pad):
    f32 = jnp.float32
    bf16 = jnp.bfloat16
    nb, L, H = x_ref.shape               # block: (batch_block, seq, hidden)
    hd = head_size
    G = nb * heads                       # flattened (batch_block * heads)

    x = x_ref[...]                       # (nb, L, H) float32
    x_flat = x.reshape(nb * L, H)

    # Replicate per-head weights across the batch block so every contraction is
    # a single 3-D batched matmul (batch dim = G).  Leading-dim broadcasts and
    # reshapes only -> no lane/sublane relayouts.
    def rep(ref):                        # (heads, a, b) -> (G, a, b)
        w = ref[...]
        return jnp.broadcast_to(w[None], (nb,) + w.shape).reshape((G,) + w.shape[1:])

    xg = jnp.broadcast_to(x.astype(bf16)[:, None],
                          (nb, heads, L, H)).reshape(G, L, H)

    # --- multi-head self-attention ------------------------------------------
    q = jnp.einsum('gle,ged->gld', xg, rep(wq_ref),
                   preferred_element_type=f32) + rep(bq_ref)      # (G, L, hd)
    k = jnp.einsum('gle,ged->gld', xg, rep(wk_ref),
                   preferred_element_type=f32) + rep(bk_ref)
    v = jnp.einsum('gle,ged->gld', xg, rep(wv_ref),
                   preferred_element_type=f32) + rep(bv_ref)

    # q . k^T via contraction on the last axes (no explicit transpose).
    scale = f32(1.0 / math.sqrt(hd))
    sims = jnp.einsum('gqd,gkd->gqk', q.astype(bf16), k.astype(bf16),
                      preferred_element_type=f32) * scale         # (G, L, L)

    # Key-padding mask -> additive bias, computed once and broadcast over heads.
    mask = mask_ref[...]                                          # (nb, 1, L)
    kbias = jnp.where(mask == 0, f32(-1e9), f32(0.0))
    sims = sims + jnp.broadcast_to(kbias[:, None],
                                   (nb, heads, 1, L)).reshape(G, 1, L)

    # Softmax over keys; reciprocal routed to the EUP (approx) instead of VALU.
    m = jnp.max(sims, axis=-1, keepdims=True)
    e = jnp.exp(sims - m)
    att = e * pl.reciprocal(jnp.sum(e, axis=-1, keepdims=True), approx=True)

    ctx = jnp.einsum('gqk,gkd->gqd', att.astype(bf16), v.astype(bf16),
                     preferred_element_type=f32)                  # (G, L, hd)

    # Output projection: concat(heads) @ Wo == sum_h ctx_h @ Wo_h.
    part = jnp.einsum('gld,gdo->glo', ctx.astype(bf16), rep(wo_ref),
                      preferred_element_type=f32)                 # (G, L, H)
    align = part.reshape(nb, heads, L, H).sum(axis=1).reshape(nb * L, H) \
        + bo_ref[...]

    y = _layer_norm(align, g1_ref[...], be1_ref[...]) + x_flat    # MHSA + residual

    # --- position-wise feed-forward ------------------------------------------
    h1 = jnp.maximum(
        jnp.dot(y.astype(bf16), w1_ref[...], preferred_element_type=f32)
        + b1_ref[...], 0.0)
    h2 = jnp.dot(h1.astype(bf16), w2_ref[...], preferred_element_type=f32) \
        + b2_ref[...]
    # TODO(synk): dropout is identity (eval mode); not applied in the kernel.
    z = _layer_norm(h2, g2_ref[...], be2_ref[...]) + y            # FFN + residual

    # Lane-dense store: pad last dim to a multiple of 128 (sliced in wrapper).
    if out_pad:
        z = jnp.concatenate([z, jnp.zeros((nb * L, out_pad), f32)], axis=-1)
    out_ref[...] = z.reshape(nb, L, H + out_pad)


def encoder_layer(x, key_padding_mask, params, heads, *, batch_block=None):
    N, L, H = x.shape
    assert H % heads == 0
    hd = H // heads
    nb = N if batch_block is None else min(batch_block, N)
    assert N % nb == 0, "batch must be divisible by the per-step batch block"
    H_pad = H if H % 128 == 0 else ((H + 127) // 128) * 128

    f32, bf16 = jnp.float32, jnp.bfloat16
    # Wrapper-side layout plumbing: per-head weight slabs + bf16 matmul weights.
    wq = params["wq"].reshape(H, heads, hd).transpose(1, 0, 2).astype(bf16)
    wk = params["wk"].reshape(H, heads, hd).transpose(1, 0, 2).astype(bf16)
    wv = params["wv"].reshape(H, heads, hd).transpose(1, 0, 2).astype(bf16)
    wo = params["wo"].reshape(heads, hd, H).astype(bf16)
    bq = params["bq"].reshape(heads, 1, hd).astype(f32)
    bk = params["bk"].reshape(heads, 1, hd).astype(f32)
    bv = params["bv"].reshape(heads, 1, hd).astype(f32)
    bo = params["bo"].reshape(1, H).astype(f32)
    w1 = params["w1"].astype(bf16)
    w2 = params["w2"].astype(bf16)
    b1 = params["b1"].astype(f32)
    b2 = params["b2"].astype(f32)
    g1, be1 = params["ln1_g"].astype(f32), params["ln1_b"].astype(f32)
    g2, be2 = params["ln2_g"].astype(f32), params["ln2_b"].astype(f32)

    mask3 = key_padding_mask.reshape(N, 1, L).astype(jnp.int32)
    operands = [x.astype(f32), mask3,
                wq, bq, wk, bk, wv, bv, wo, bo, g1, be1,
                w1, b1, w2, b2, g2, be2]

    in_specs = [pl.BlockSpec((nb, L, H), lambda n: (n, 0, 0)),
                pl.BlockSpec((nb, 1, L), lambda n: (n, 0, 0))]
    for p in operands[2:]:
        in_specs.append(pl.BlockSpec(p.shape, lambda n, nd=p.ndim: (0,) * nd))

    kernel = functools.partial(_encoder_layer_kernel, heads=heads,
                               head_size=hd, out_pad=H_pad - H)
    out = pl.pallas_call(
        kernel,
        out_shape=jax.ShapeDtypeStruct((N, L, H_pad), jnp.float32),
        grid=(N // nb,),
        in_specs=in_specs,
        out_specs=pl.BlockSpec((nb, L, H_pad), lambda n: (n, 0, 0)),
        compiler_params=pltpu.CompilerParams(
            dimension_semantics=("parallel",),
            vmem_limit_bytes=32 * 1024 * 1024),
    )(*operands)
    return out[:, :, :H] if H_pad != H else out


# ---------------------------- pure-JAX reference ----------------------------
def encoder_layer_ref(x, mask, p, heads, matmul_dtype=jnp.float32):
    N, L, H = x.shape
    hd = H // heads
    md = matmul_dtype

    def mm(a, b):
        return jnp.dot(a.astype(md), b.astype(md),
                       preferred_element_type=jnp.float32)

    def ln(t, g, b):
        mu = t.mean(-1, keepdims=True)
        var = ((t - mu) ** 2).mean(-1, keepdims=True)
        return (t - mu) / jnp.sqrt(var + 1e-5) * g + b

    q = (mm(x, p["wq"]) + p["bq"]).reshape(N, L, heads, hd).transpose(0, 2, 1, 3)
    k = (mm(x, p["wk"]) + p["bk"]).reshape(N, L, heads, hd).transpose(0, 2, 1, 3)
    v = (mm(x, p["wv"]) + p["bv"]).reshape(N, L, heads, hd).transpose(0, 2, 1, 3)
    sims = jnp.einsum("nhqd,nhkd->nhqk", q.astype(md), k.astype(md),
                      preferred_element_type=jnp.float32) / math.sqrt(hd)
    sims = jnp.where(mask.reshape(N, 1, 1, L) == 0, -1e9, sims)
    att = jax.nn.softmax(sims, axis=-1)
    ctx = jnp.einsum("nhqk,nhkd->nhqd", att.astype(md), v.astype(md),
                     preferred_element_type=jnp.float32)
    concat = ctx.transpose(0, 2, 1, 3).reshape(N, L, H)
    align = mm(concat, p["wo"]) + p["bo"]
    y = ln(align, p["ln1_g"], p["ln1_b"]) + x
    h1 = jax.nn.relu(mm(y, p["w1"]) + p["b1"])
    h2 = mm(h1, p["w2"]) + p["b2"]
    return ln(h2, p["ln2_g"], p["ln2_b"]) + y


# ------------------------------ param init ----------------------------------
def init_params(key, hidden_size, ffn_size):
    keys = jax.random.split(key, 12)

    def lin(kw, kb, din, dout):
        w = jax.random.normal(kw, (din, dout), jnp.float32) / math.sqrt(din)
        b = 0.01 * jax.random.normal(kb, (1, dout), jnp.float32)
        return w, b

    H, F = hidden_size, ffn_size
    wq, bq = lin(keys[0], keys[1], H, H)
    wk, bk = lin(keys[2], keys[3], H, H)
    wv, bv = lin(keys[4], keys[5], H, H)
    wo, bo = lin(keys[6], keys[7], H, H)
    w1, b1 = lin(keys[8], keys[9], H, F)
    w2, b2 = lin(keys[10], keys[11], F, H)
    ar = jnp.arange(H, dtype=jnp.float32).reshape(1, H) / H
    ln1_g = jnp.ones((1, H), jnp.float32) + 0.1 * ar
    ln1_b = 0.05 * jnp.ones((1, H), jnp.float32)
    ln2_g = jnp.ones((1, H), jnp.float32) - 0.1 * ar
    ln2_b = -0.05 * jnp.ones((1, H), jnp.float32)
    return {"wq": wq, "bq": bq, "wk": wk, "bk": bk, "wv": wv, "bv": bv,
            "wo": wo, "bo": bo, "ln1_g": ln1_g, "ln1_b": ln1_b,
            "w1": w1, "b1": b1, "w2": w2, "b2": b2,
            "ln2_g": ln2_g, "ln2_b": ln2_b}


if __name__ == "__main__":
    N, L, H, F, heads = 2, 8, 32, 64, 4   # batch, max_length, hidden, ffn, heads

    key = jax.random.PRNGKey(0)
    kx, kp = jax.random.split(key)
    x = jax.random.normal(kx, (N, L, H), jnp.float32)
    # key padding mask: sample 0 fully valid, sample 1 has last 2 positions padded.
    key_padding_mask = jnp.array(
        [[1] * L, [1] * (L - 2) + [0] * 2], dtype=jnp.int32)

    params = init_params(kp, H, F)

    out = encoder_layer(x, key_padding_mask, params, heads)
    out = jax.block_until_ready(out)

    # Reference with bf16 matmuls (matching the kernel's MXU precision).
    # Tolerance covers the approximate EUP reciprocal in the softmax.
    ref = encoder_layer_ref(x, key_padding_mask, params, heads,
                            matmul_dtype=jnp.bfloat16)
    assert out.shape == (N, L, H)
    assert bool(jnp.all(jnp.isfinite(out)))
    err = float(jnp.max(jnp.abs(out - ref)))
    assert jnp.allclose(out, ref, rtol=5e-2, atol=5e-2), f"max abs err = {err}"

    print("KERNEL_OK")
</pallas_src>

<mosaic_0001>
module attributes {stable_mosaic.version = 11 : i64} {
  func.func @_encoder_layer_kernel(%arg0: i32, %arg1: memref<2x8x32xf32, #tpu.memory_space<vmem>>, %arg2: memref<2x1x8xi32, #tpu.memory_space<vmem>>, %arg3: memref<4x32x8xbf16, #tpu.memory_space<vmem>>, %arg4: memref<4x1x8xf32, #tpu.memory_space<vmem>>, %arg5: memref<4x32x8xbf16, #tpu.memory_space<vmem>>, %arg6: memref<4x1x8xf32, #tpu.memory_space<vmem>>, %arg7: memref<4x32x8xbf16, #tpu.memory_space<vmem>>, %arg8: memref<4x1x8xf32, #tpu.memory_space<vmem>>, %arg9: memref<4x8x32xbf16, #tpu.memory_space<vmem>>, %arg10: memref<1x32xf32, #tpu.memory_space<vmem>>, %arg11: memref<1x32xf32, #tpu.memory_space<vmem>>, %arg12: memref<1x32xf32, #tpu.memory_space<vmem>>, %arg13: memref<32x64xbf16, #tpu.memory_space<vmem>>, %arg14: memref<1x64xf32, #tpu.memory_space<vmem>>, %arg15: memref<64x32xbf16, #tpu.memory_space<vmem>>, %arg16: memref<1x32xf32, #tpu.memory_space<vmem>>, %arg17: memref<1x32xf32, #tpu.memory_space<vmem>>, %arg18: memref<1x32xf32, #tpu.memory_space<vmem>>, %arg19: memref<2x8x128xf32, #tpu.memory_space<vmem>>) attributes {dimension_semantics = [#tpu.dimension_semantics<parallel>], iteration_bounds = array<i64: 1>, scalar_prefetch = 0 : i64, scratch_operands = 0 : i64, tpu.core_type = #tpu.core_type<tc>, window_params = [{transform_indices = @transform_0, window_bounds = array<i64: 2, 8, 32>}, {transform_indices = @transform_1, window_bounds = array<i64: 2, 1, 8>}, {pipeline_mode = #tpu.pipeline_mode<synchronous>, transform_indices = @transform_2, window_bounds = array<i64: 4, 32, 8>}, {pipeline_mode = #tpu.pipeline_mode<synchronous>, transform_indices = @transform_3, window_bounds = array<i64: 4, 1, 8>}, {pipeline_mode = #tpu.pipeline_mode<synchronous>, transform_indices = @transform_4, window_bounds = array<i64: 4, 32, 8>}, {pipeline_mode = #tpu.pipeline_mode<synchronous>, transform_indices = @transform_5, window_bounds = array<i64: 4, 1, 8>}, {pipeline_mode = #tpu.pipeline_mode<synchronous>, transform_indices = @transform_6, window_bounds = array<i64: 4, 32, 8>}, {pipeline_mode = #tpu.pipeline_mode<synchronous>, transform_indices = @transform_7, window_bounds = array<i64: 4, 1, 8>}, {pipeline_mode = #tpu.pipeline_mode<synchronous>, transform_indices = @transform_8, window_bounds = array<i64: 4, 8, 32>}, {pipeline_mode = #tpu.pipeline_mode<synchronous>, transform_indices = @transform_9, window_bounds = array<i64: 1, 32>}, {pipeline_mode = #tpu.pipeline_mode<synchronous>, transform_indices = @transform_10, window_bounds = array<i64: 1, 32>}, {pipeline_mode = #tpu.pipeline_mode<synchronous>, transform_indices = @transform_11, window_bounds = array<i64: 1, 32>}, {pipeline_mode = #tpu.pipeline_mode<synchronous>, transform_indices = @transform_12, window_bounds = array<i64: 32, 64>}, {pipeline_mode = #tpu.pipeline_mode<synchronous>, transform_indices = @transform_13, window_bounds = array<i64: 1, 64>}, {pipeline_mode = #tpu.pipeline_mode<synchronous>, transform_indices = @transform_14, window_bounds = array<i64: 64, 32>}, {pipeline_mode = #tpu.pipeline_mode<synchronous>, transform_indices = @transform_15, window_bounds = array<i64: 1, 32>}, {pipeline_mode = #tpu.pipeline_mode<synchronous>, transform_indices = @transform_16, window_bounds = array<i64: 1, 32>}, {pipeline_mode = #tpu.pipeline_mode<synchronous>, transform_indices = @transform_17, window_bounds = array<i64: 1, 32>}, {transform_indices = @transform_18, window_bounds = array<i64: 2, 8, 128>}]} {
    %c0 = arith.constant 0 : index
    %c0_0 = arith.constant 0 : index
    %c0_1 = arith.constant 0 : index
    %0 = vector.load %arg1[%c0, %c0_0, %c0_1] : memref<2x8x32xf32, #tpu.memory_space<vmem>>, vector<2x8x32xf32>
    %1 = vector.shape_cast %0 : vector<2x8x32xf32> to vector<16x32xf32>
    %2 = arith.truncf %0 : vector<2x8x32xf32> to vector<2x8x32xbf16>
    %3 = vector.shape_cast %2 : vector<2x8x32xbf16> to vector<2x1x8x32xbf16>
    %4 = vector.shape_cast %3 : vector<2x1x8x32xbf16> to vector<2x1x8x32xbf16>
    %5 = vector.broadcast %4 : vector<2x1x8x32xbf16> to vector<2x4x8x32xbf16>
    %6 = vector.shape_cast %5 : vector<2x4x8x32xbf16> to vector<8x8x32xbf16>
    %c0_2 = arith.constant 0 : index
    %c0_3 = arith.constant 0 : index
    %c0_4 = arith.constant 0 : index
    %7 = vector.load %arg3[%c0_2, %c0_3, %c0_4] : memref<4x32x8xbf16, #tpu.memory_space<vmem>>, vector<4x32x8xbf16>
    %8 = vector.shape_cast %7 : vector<4x32x8xbf16> to vector<1x4x32x8xbf16>
    %9 = vector.shape_cast %8 : vector<1x4x32x8xbf16> to vector<1x4x32x8xbf16>
    %10 = vector.broadcast %9 : vector<1x4x32x8xbf16> to vector<2x4x32x8xbf16>
    %11 = vector.shape_cast %10 : vector<2x4x32x8xbf16> to vector<8x32x8xbf16>
    "tpu.trace_start"() <{level = 10 : i32, message = "gle,ged->gld"}> : () -> ()
    %cst = arith.constant dense<0.000000e+00> : vector<8x8x8xf32>
    %12 = tpu.matmul %6, %11, %cst {dimension_numbers = #tpu.dot_dimension_numbers<[2], [1], [1], [2], [0, 0, 0, 1, 1, 2], [0], [0]>} : vector<8x8x32xbf16>, vector<8x32x8xbf16>, vector<8x8x8xf32> -> vector<8x8x8xf32>
    "tpu.trace_stop"() : () -> ()
    %c0_5 = arith.constant 0 : index
    %c0_6 = arith.constant 0 : index
    %c0_7 = arith.constant 0 : index
    %13 = vector.load %arg4[%c0_5, %c0_6, %c0_7] : memref<4x1x8xf32, #tpu.memory_space<vmem>>, vector<4x1x8xf32>
    %14 = vector.shape_cast %13 : vector<4x1x8xf32> to vector<1x4x1x8xf32>
    %15 = vector.shape_cast %14 : vector<1x4x1x8xf32> to vector<1x4x1x8xf32>
    %16 = vector.broadcast %15 : vector<1x4x1x8xf32> to vector<2x4x1x8xf32>
    %17 = vector.shape_cast %16 : vector<2x4x1x8xf32> to vector<8x1x8xf32>
    %18 = vector.broadcast %17 : vector<8x1x8xf32> to vector<8x8x8xf32>
    %19 = arith.addf %12, %18 : vector<8x8x8xf32>
    %c0_8 = arith.constant 0 : index
    %c0_9 = arith.constant 0 : index
    %c0_10 = arith.constant 0 : index
    %20 = vector.load %arg5[%c0_8, %c0_9, %c0_10] : memref<4x32x8xbf16, #tpu.memory_space<vmem>>, vector<4x32x8xbf16>
    %21 = vector.shape_cast %20 : vector<4x32x8xbf16> to vector<1x4x32x8xbf16>
    %22 = vector.shape_cast %21 : vector<1x4x32x8xbf16> to vector<1x4x32x8xbf16>
    %23 = vector.broadcast %22 : vector<1x4x32x8xbf16> to vector<2x4x32x8xbf16>
    %24 = vector.shape_cast %23 : vector<2x4x32x8xbf16> to vector<8x32x8xbf16>
    "tpu.trace_start"() <{level = 10 : i32, message = "gle,ged->gld"}> : () -> ()
    %cst_11 = arith.constant dense<0.000000e+00> : vector<8x8x8xf32>
    %25 = tpu.matmul %6, %24, %cst_11 {dimension_numbers = #tpu.dot_dimension_numbers<[2], [1], [1], [2], [0, 0, 0, 1, 1, 2], [0], [0]>} : vector<8x8x32xbf16>, vector<8x32x8xbf16>, vector<8x8x8xf32> -> vector<8x8x8xf32>
    "tpu.trace_stop"() : () -> ()
    %c0_12 = arith.constant 0 : index
    %c0_13 = arith.constant 0 : index
    %c0_14 = arith.constant 0 : index
    %26 = vector.load %arg6[%c0_12, %c0_13, %c0_14] : memref<4x1x8xf32, #tpu.memory_space<vmem>>, vector<4x1x8xf32>
    %27 = vector.shape_cast %26 : vector<4x1x8xf32> to vector<1x4x1x8xf32>
    %28 = vector.shape_cast %27 : vector<1x4x1x8xf32> to vector<1x4x1x8xf32>
    %29 = vector.broadcast %28 : vector<1x4x1x8xf32> to vector<2x4x1x8xf32>
    %30 = vector.shape_cast %29 : vector<2x4x1x8xf32> to vector<8x1x8xf32>
    %31 = vector.broadcast %30 : vector<8x1x8xf32> to vector<8x8x8xf32>
    %32 = arith.addf %25, %31 : vector<8x8x8xf32>
    %c0_15 = arith.constant 0 : index
    %c0_16 = arith.constant 0 : index
    %c0_17 = arith.constant 0 : index
    %33 = vector.load %arg7[%c0_15, %c0_16, %c0_17] : memref<4x32x8xbf16, #tpu.memory_space<vmem>>, vector<4x32x8xbf16>
    %34 = vector.shape_cast %33 : vector<4x32x8xbf16> to vector<1x4x32x8xbf16>
    %35 = vector.shape_cast %34 : vector<1x4x32x8xbf16> to vector<1x4x32x8xbf16>
    %36 = vector.broadcast %35 : vector<1x4x32x8xbf16> to vector<2x4x32x8xbf16>
    %37 = vector.shape_cast %36 : vector<2x4x32x8xbf16> to vector<8x32x8xbf16>
    "tpu.trace_start"() <{level = 10 : i32, message = "gle,ged->gld"}> : () -> ()
    %cst_18 = arith.constant dense<0.000000e+00> : vector<8x8x8xf32>
    %38 = tpu.matmul %6, %37, %cst_18 {dimension_numbers = #tpu.dot_dimension_numbers<[2], [1], [1], [2], [0, 0, 0, 1, 1, 2], [0], [0]>} : vector<8x8x32xbf16>, vector<8x32x8xbf16>, vector<8x8x8xf32> -> vector<8x8x8xf32>
    "tpu.trace_stop"() : () -> ()
    %c0_19 = arith.constant 0 : index
    %c0_20 = arith.constant 0 : index
    %c0_21 = arith.constant 0 : index
    %39 = vector.load %arg8[%c0_19, %c0_20, %c0_21] : memref<4x1x8xf32, #tpu.memory_space<vmem>>, vector<4x1x8xf32>
    %40 = vector.shape_cast %39 : vector<4x1x8xf32> to vector<1x4x1x8xf32>
    %41 = vector.shape_cast %40 : vector<1x4x1x8xf32> to vector<1x4x1x8xf32>
    %42 = vector.broadcast %41 : vector<1x4x1x8xf32> to vector<2x4x1x8xf32>
    %43 = vector.shape_cast %42 : vector<2x4x1x8xf32> to vector<8x1x8xf32>
    %44 = vector.broadcast %43 : vector<8x1x8xf32> to vector<8x8x8xf32>
    %45 = arith.addf %38, %44 : vector<8x8x8xf32>
    %46 = arith.truncf %19 : vector<8x8x8xf32> to vector<8x8x8xbf16>
    %47 = arith.truncf %32 : vector<8x8x8xf32> to vector<8x8x8xbf16>
    "tpu.trace_start"() <{level = 10 : i32, message = "gqd,gkd->gqk"}> : () -> ()
    %cst_22 = arith.constant dense<0.000000e+00> : vector<8x8x8xf32>
    %48 = tpu.matmul %46, %47, %cst_22 {dimension_numbers = #tpu.dot_dimension_numbers<[2], [2], [1], [1], [0, 0, 0, 1, 1, 1], [0], [0]>} : vector<8x8x8xbf16>, vector<8x8x8xbf16>, vector<8x8x8xf32> -> vector<8x8x8xf32>
    "tpu.trace_stop"() : () -> ()
    %cst_23 = arith.constant 0.353553385 : f32
    %49 = vector.broadcast %cst_23 : f32 to vector<8x8x8xf32>
    %50 = arith.mulf %48, %49 : vector<8x8x8xf32>
    %c0_24 = arith.constant 0 : index
    %c0_25 = arith.constant 0 : index
    %c0_26 = arith.constant 0 : index
    %51 = vector.load %arg2[%c0_24, %c0_25, %c0_26] : memref<2x1x8xi32, #tpu.memory_space<vmem>>, vector<2x1x8xi32>
    %c0_i32 = arith.constant 0 : i32
    %52 = vector.broadcast %c0_i32 : i32 to vector<2x1x8xi32>
    %53 = arith.cmpi eq, %51, %52 : vector<2x1x8xi32>
    %cst_27 = arith.constant -1.000000e+09 : f32
    %cst_28 = arith.constant 0.000000e+00 : f32
    %54 = vector.broadcast %cst_27 : f32 to vector<2x1x8xf32>
    %55 = vector.broadcast %cst_28 : f32 to vector<2x1x8xf32>
    %56 = arith.select %53, %54, %55 : vector<2x1x8xi1>, vector<2x1x8xf32>
    %57 = vector.shape_cast %56 : vector<2x1x8xf32> to vector<2x1x1x8xf32>
    %58 = vector.shape_cast %57 : vector<2x1x1x8xf32> to vector<2x1x1x8xf32>
    %59 = vector.broadcast %58 : vector<2x1x1x8xf32> to vector<2x4x1x8xf32>
    %60 = vector.shape_cast %59 : vector<2x4x1x8xf32> to vector<8x1x8xf32>
    %61 = vector.broadcast %60 : vector<8x1x8xf32> to vector<8x8x8xf32>
    %62 = arith.addf %50, %61 : vector<8x8x8xf32>
    %cst_29 = arith.constant dense<0xFF800000> : vector<8x8xf32>
    %63 = vector.multi_reduction <maximumf>, %62, %cst_29 [2] : vector<8x8x8xf32> to vector<8x8xf32>
    %64 = vector.shape_cast %63 : vector<8x8xf32> to vector<8x8x1xf32>
    %65 = vector.broadcast %64 : vector<8x8x1xf32> to vector<8x8x8xf32>
    %66 = arith.subf %62, %65 : vector<8x8x8xf32>
    %67 = math.exp %66 : vector<8x8x8xf32>
    %cst_30 = arith.constant dense<0.000000e+00> : vector<8x8xf32>
    %68 = vector.multi_reduction <add>, %67, %cst_30 [2] : vector<8x8x8xf32> to vector<8x8xf32>
    %69 = vector.shape_cast %68 : vector<8x8xf32> to vector<8x8x1xf32>
    %70 = tpu.reciprocal %69 {approx = true} : vector<8x8x1xf32> -> vector<8x8x1xf32>
    %71 = vector.broadcast %70 : vector<8x8x1xf32> to vector<8x8x8xf32>
    %72 = arith.mulf %67, %71 : vector<8x8x8xf32>
    %73 = arith.truncf %72 : vector<8x8x8xf32> to vector<8x8x8xbf16>
    %74 = arith.truncf %45 : vector<8x8x8xf32> to vector<8x8x8xbf16>
    "tpu.trace_start"() <{level = 10 : i32, message = "gqk,gkd->gqd"}> : () -> ()
    %cst_31 = arith.constant dense<0.000000e+00> : vector<8x8x8xf32>
    %75 = tpu.matmul %73, %74, %cst_31 {dimension_numbers = #tpu.dot_dimension_numbers<[2], [1], [1], [2], [0, 0, 0, 1, 1, 2], [0], [0]>} : vector<8x8x8xbf16>, vector<8x8x8xbf16>, vector<8x8x8xf32> -> vector<8x8x8xf32>
    "tpu.trace_stop"() : () -> ()
    %76 = arith.truncf %75 : vector<8x8x8xf32> to vector<8x8x8xbf16>
    %c0_32 = arith.constant 0 : index
    %c0_33 = arith.constant 0 : index
    %c0_34 = arith.constant 0 : index
    %77 = vector.load %arg9[%c0_32, %c0_33, %c0_34] : memref<4x8x32xbf16, #tpu.memory_space<vmem>>, vector<4x8x32xbf16>
    %78 = vector.shape_cast %77 : vector<4x8x32xbf16> to vector<1x4x8x32xbf16>
    %79 = vector.shape_cast %78 : vector<1x4x8x32xbf16> to vector<1x4x8x32xbf16>
    %80 = vector.broadcast %79 : vector<1x4x8x32xbf16> to vector<2x4x8x32xbf16>
    %81 = vector.shape_cast %80 : vector<2x4x8x32xbf16> to vector<8x8x32xbf16>
    "tpu.trace_start"() <{level = 10 : i32, message = "gld,gdo->glo"}> : () -> ()
    %cst_35 = arith.constant dense<0.000000e+00> : vector<8x8x32xf32>
    %82 = tpu.matmul %76, %81, %cst_35 {dimension_numbers = #tpu.dot_dimension_numbers<[2], [1], [1], [2], [0, 0, 0, 1, 1, 2], [0], [0]>} : vector<8x8x8xbf16>, vector<8x8x32xbf16>, vector<8x8x32xf32> -> vector<8x8x32xf32>
    "tpu.trace_stop"() : () -> ()
    %83 = vector.shape_cast %82 : vector<8x8x32xf32> to vector<2x4x8x32xf32>
    %cst_36 = arith.constant dense<0.000000e+00> : vector<2x8x32xf32>
    %84 = vector.multi_reduction <add>, %83, %cst_36 [1] : vector<2x4x8x32xf32> to vector<2x8x32xf32>
    %85 = vector.shape_cast %84 : vector<2x8x32xf32> to vector<16x32xf32>
    %c0_37 = arith.constant 0 : index
    %c0_38 = arith.constant 0 : index
    %86 = vector.load %arg10[%c0_37, %c0_38] : memref<1x32xf32, #tpu.memory_space<vmem>>, vector<1x32xf32>
    %87 = vector.broadcast %86 : vector<1x32xf32> to vector<16x32xf32>
    %88 = arith.addf %85, %87 : vector<16x32xf32>
    %c0_39 = arith.constant 0 : index
    %c0_40 = arith.constant 0 : index
    %89 = vector.load %arg11[%c0_39, %c0_40] : memref<1x32xf32, #tpu.memory_space<vmem>>, vector<1x32xf32>
    %c0_41 = arith.constant 0 : index
    %c0_42 = arith.constant 0 : index
    %90 = vector.load %arg12[%c0_41, %c0_42] : memref<1x32xf32, #tpu.memory_space<vmem>>, vector<1x32xf32>
    %cst_43 = arith.constant dense<0.000000e+00> : vector<16xf32>
    %91 = vector.multi_reduction <add>, %88, %cst_43 [1] : vector<16x32xf32> to vector<16xf32>
    %92 = vector.shape_cast %91 : vector<16xf32> to vector<16x1xf32>
    %cst_44 = arith.constant 3.200000e+01 : f32
    %93 = vector.broadcast %cst_44 : f32 to vector<16x1xf32>
    %94 = arith.divf %92, %93 : vector<16x1xf32>
    %95 = vector.broadcast %94 : vector<16x1xf32> to vector<16x32xf32>
    %96 = arith.subf %88, %95 : vector<16x32xf32>
    %97 = arith.mulf %96, %96 : vector<16x32xf32>
    %cst_45 = arith.constant dense<0.000000e+00> : vector<16xf32>
    %98 = vector.multi_reduction <add>, %97, %cst_45 [1] : vector<16x32xf32> to vector<16xf32>
    %99 = vector.shape_cast %98 : vector<16xf32> to vector<16x1xf32>
    %cst_46 = arith.constant 3.200000e+01 : f32
    %100 = vector.broadcast %cst_46 : f32 to vector<16x1xf32>
    %101 = arith.divf %99, %100 : vector<16x1xf32>
    %102 = vector.broadcast %94 : vector<16x1xf32> to vector<16x32xf32>
    %103 = arith.subf %88, %102 : vector<16x32xf32>
    %cst_47 = arith.constant 9.99999974E-6 : f32
    %104 = vector.broadcast %cst_47 : f32 to vector<16x1xf32>
    %105 = arith.addf %101, %104 : vector<16x1xf32>
    %106 = math.rsqrt %105 : vector<16x1xf32>
    %107 = vector.broadcast %106 : vector<16x1xf32> to vector<16x32xf32>
    %108 = arith.mulf %103, %107 : vector<16x32xf32>
    %109 = vector.broadcast %89 : vector<1x32xf32> to vector<16x32xf32>
    %110 = arith.mulf %108, %109 : vector<16x32xf32>
    %111 = vector.broadcast %90 : vector<1x32xf32> to vector<16x32xf32>
    %112 = arith.addf %110, %111 : vector<16x32xf32>
    %113 = arith.addf %112, %1 : vector<16x32xf32>
    %114 = arith.truncf %113 : vector<16x32xf32> to vector<16x32xbf16>
    %c0_48 = arith.constant 0 : index
    %c0_49 = arith.constant 0 : index
    %115 = vector.load %arg13[%c0_48, %c0_49] : memref<32x64xbf16, #tpu.memory_space<vmem>>, vector<32x64xbf16>
    %cst_50 = arith.constant dense<0.000000e+00> : vector<16x64xf32>
    %116 = tpu.matmul %114, %115, %cst_50 {dimension_numbers = #tpu.dot_dimension_numbers<[1], [0], [0], [1], [0, 0, 1, 1], [], []>} : vector<16x32xbf16>, vector<32x64xbf16>, vector<16x64xf32> -> vector<16x64xf32>
    %c0_51 = arith.constant 0 : index
    %c0_52 = arith.constant 0 : index
    %117 = vector.load %arg14[%c0_51, %c0_52] : memref<1x64xf32, #tpu.memory_space<vmem>>, vector<1x64xf32>
    %118 = vector.broadcast %117 : vector<1x64xf32> to vector<16x64xf32>
    %119 = arith.addf %116, %118 : vector<16x64xf32>
    %cst_53 = arith.constant 0.000000e+00 : f32
    %120 = vector.broadcast %cst_53 : f32 to vector<16x64xf32>
    %121 = arith.maximumf %119, %120 : vector<16x64xf32>
    %122 = arith.truncf %121 : vector<16x64xf32> to vector<16x64xbf16>
    %c0_54 = arith.constant 0 : index
    %c0_55 = arith.constant 0 : index
    %123 = vector.load %arg15[%c0_54, %c0_55] : memref<64x32xbf16, #tpu.memory_space<vmem>>, vector<64x32xbf16>
    %cst_56 = arith.constant dense<0.000000e+00> : vector<16x32xf32>
    %124 = tpu.matmul %122, %123, %cst_56 {dimension_numbers = #tpu.dot_dimension_numbers<[1], [0], [0], [1], [0, 0, 1, 1], [], []>} : vector<16x64xbf16>, vector<64x32xbf16>, vector<16x32xf32> -> vector<16x32xf32>
    %c0_57 = arith.constant 0 : index
    %c0_58 = arith.constant 0 : index
    %125 = vector.load %arg16[%c0_57, %c0_58] : memref<1x32xf32, #tpu.memory_space<vmem>>, vector<1x32xf32>
    %126 = vector.broadcast %125 : vector<1x32xf32> to vector<16x32xf32>
    %127 = arith.addf %124, %126 : vector<16x32xf32>
    %c0_59 = arith.constant 0 : index
    %c0_60 = arith.constant 0 : index
    %128 = vector.load %arg17[%c0_59, %c0_60] : memref<1x32xf32, #tpu.memory_space<vmem>>, vector<1x32xf32>
    %c0_61 = arith.constant 0 : index
    %c0_62 = arith.constant 0 : index
    %129 = vector.load %arg18[%c0_61, %c0_62] : memref<1x32xf32, #tpu.memory_space<vmem>>, vector<1x32xf32>
    %cst_63 = arith.constant dense<0.000000e+00> : vector<16xf32>
    %130 = vector.multi_reduction <add>, %127, %cst_63 [1] : vector<16x32xf32> to vector<16xf32>
    %131 = vector.shape_cast %130 : vector<16xf32> to vector<16x1xf32>
    %cst_64 = arith.constant 3.200000e+01 : f32
    %132 = vector.broadcast %cst_64 : f32 to vector<16x1xf32>
    %133 = arith.divf %131, %132 : vector<16x1xf32>
    %134 = vector.broadcast %133 : vector<16x1xf32> to vector<16x32xf32>
    %135 = arith.subf %127, %134 : vector<16x32xf32>
    %136 = arith.mulf %135, %135 : vector<16x32xf32>
    %cst_65 = arith.constant dense<0.000000e+00> : vector<16xf32>
    %137 = vector.multi_reduction <add>, %136, %cst_65 [1] : vector<16x32xf32> to vector<16xf32>
    %138 = vector.shape_cast %137 : vector<16xf32> to vector<16x1xf32>
    %cst_66 = arith.constant 3.200000e+01 : f32
    %139 = vector.broadcast %cst_66 : f32 to vector<16x1xf32>
    %140 = arith.divf %138, %139 : vector<16x1xf32>
    %141 = vector.broadcast %133 : vector<16x1xf32> to vector<16x32xf32>
    %142 = arith.subf %127, %141 : vector<16x32xf32>
    %cst_67 = arith.constant 9.99999974E-6 : f32
    %143 = vector.broadcast %cst_67 : f32 to vector<16x1xf32>
    %144 = arith.addf %140, %143 : vector<16x1xf32>
    %145 = math.rsqrt %144 : vector<16x1xf32>
    %146 = vector.broadcast %145 : vector<16x1xf32> to vector<16x32xf32>
    %147 = arith.mulf %142, %146 : vector<16x32xf32>
    %148 = vector.broadcast %128 : vector<1x32xf32> to vector<16x32xf32>
    %149 = arith.mulf %147, %148 : vector<16x32xf32>
    %150 = vector.broadcast %129 : vector<1x32xf32> to vector<16x32xf32>
    %151 = arith.addf %149, %150 : vector<16x32xf32>
    %152 = arith.addf %151, %113 : vector<16x32xf32>
    %cst_68 = arith.constant 0.000000e+00 : f32
    %153 = vector.broadcast %cst_68 : f32 to vector<16x96xf32>
    %154 = tpu.concatenate %152, %153 in 1 : vector<16x32xf32>, vector<16x96xf32> -> vector<16x128xf32>
    %155 = vector.shape_cast %154 : vector<16x128xf32> to vector<2x8x128xf32>
    %c0_69 = arith.constant 0 : index
    %c0_70 = arith.constant 0 : index
    %c0_71 = arith.constant 0 : index
    %156 = vector.load %arg19[%c0_69, %c0_70, %c0_71] : memref<2x8x128xf32, #tpu.memory_space<vmem>>, vector<2x8x128xf32>
    tpu.vector_store %arg19[%c0_69, %c0_70, %c0_71], %155 {strides = array<i32>} : memref<2x8x128xf32, #tpu.memory_space<vmem>>, vector<2x8x128xf32>,
    return
  }
  func.func @transform_0(%arg0: i32) -> (i32, i32, i32) {
    %c0_i32 = arith.constant 0 : i32
    %c0_i32_0 = arith.constant 0 : i32
    %c0_i32_1 = arith.constant 0 : i32
    return %arg0, %c0_i32, %c0_i32_0 : i32, i32, i32
  }
  func.func @transform_1(%arg0: i32) -> (i32, i32, i32) {
    %c0_i32 = arith.constant 0 : i32
    %c0_i32_0 = arith.constant 0 : i32
    %c0_i32_1 = arith.constant 0 : i32
    return %arg0, %c0_i32, %c0_i32_0 : i32, i32, i32
  }
  func.func @transform_2(%arg0: i32) -> (i32, i32, i32) {
    %c0_i32 = arith.constant 0 : i32
    %c0_i32_0 = arith.constant 0 : i32
    %c0_i32_1 = arith.constant 0 : i32
    %c0_i32_2 = arith.constant 0 : i32
    return %c0_i32, %c0_i32_0, %c0_i32_1 : i32, i32, i32
  }
  func.func @transform_3(%arg0: i32) -> (i32, i32, i32) {
    %c0_i32 = arith.constant 0 : i32
    %c0_i32_0 = arith.constant 0 : i32
    %c0_i32_1 = arith.constant 0 : i32
    %c0_i32_2 = arith.constant 0 : i32
    return %c0_i32, %c0_i32_0, %c0_i32_1 : i32, i32, i32
  }
  func.func @transform_4(%arg0: i32) -> (i32, i32, i32) {
    %c0_i32 = arith.constant 0 : i32
    %c0_i32_0 = arith.constant 0 : i32
    %c0_i32_1 = arith.constant 0 : i32
    %c0_i32_2 = arith.constant 0 : i32
    return %c0_i32, %c0_i32_0, %c0_i32_1 : i32, i32, i32
  }
  func.func @transform_5(%arg0: i32) -> (i32, i32, i32) {
    %c0_i32 = arith.constant 0 : i32
    %c0_i32_0 = arith.constant 0 : i32
    %c0_i32_1 = arith.constant 0 : i32
    %c0_i32_2 = arith.constant 0 : i32
    return %c0_i32, %c0_i32_0, %c0_i32_1 : i32, i32, i32
  }
  func.func @transform_6(%arg0: i32) -> (i32, i32, i32) {
    %c0_i32 = arith.constant 0 : i32
    %c0_i32_0 = arith.constant 0 : i32
    %c0_i32_1 = arith.constant 0 : i32
    %c0_i32_2 = arith.constant 0 : i32
    return %c0_i32, %c0_i32_0, %c0_i32_1 : i32, i32, i32
  }
  func.func @transform_7(%arg0: i32) -> (i32, i32, i32) {
    %c0_i32 = arith.constant 0 : i32
    %c0_i32_0 = arith.constant 0 : i32
    %c0_i32_1 = arith.constant 0 : i32
    %c0_i32_2 = arith.constant 0 : i32
    return %c0_i32, %c0_i32_0, %c0_i32_1 : i32, i32, i32
  }
  func.func @transform_8(%arg0: i32) -> (i32, i32, i32) {
    %c0_i32 = arith.constant 0 : i32
    %c0_i32_0 = arith.constant 0 : i32
    %c0_i32_1 = arith.constant 0 : i32
    %c0_i32_2 = arith.constant 0 : i32
    return %c0_i32, %c0_i32_0, %c0_i32_1 : i32, i32, i32
  }
  func.func @transform_9(%arg0: i32) -> (i32, i32) {
    %c0_i32 = arith.constant 0 : i32
    %c0_i32_0 = arith.constant 0 : i32
    %c0_i32_1 = arith.constant 0 : i32
    return %c0_i32, %c0_i32_0 : i32, i32
  }
  func.func @transform_10(%arg0: i32) -> (i32, i32) {
    %c0_i32 = arith.constant 0 : i32
    %c0_i32_0 = arith.constant 0 : i32
    %c0_i32_1 = arith.constant 0 : i32
    return %c0_i32, %c0_i32_0 : i32, i32
  }
  func.func @transform_11(%arg0: i32) -> (i32, i32) {
    %c0_i32 = arith.constant 0 : i32
    %c0_i32_0 = arith.constant 0 : i32
    %c0_i32_1 = arith.constant 0 : i32
    return %c0_i32, %c0_i32_0 : i32, i32
  }
  func.func @transform_12(%arg0: i32) -> (i32, i32) {
    %c0_i32 = arith.constant 0 : i32
    %c0_i32_0 = arith.constant 0 : i32
    %c0_i32_1 = arith.constant 0 : i32
    return %c0_i32, %c0_i32_0 : i32, i32
  }
  func.func @transform_13(%arg0: i32) -> (i32, i32) {
    %c0_i32 = arith.constant 0 : i32
    %c0_i32_0 = arith.constant 0 : i32
    %c0_i32_1 = arith.constant 0 : i32
    return %c0_i32, %c0_i32_0 : i32, i32
  }
  func.func @transform_14(%arg0: i32) -> (i32, i32) {
    %c0_i32 = arith.constant 0 : i32
    %c0_i32_0 = arith.constant 0 : i32
    %c0_i32_1 = arith.constant 0 : i32
    return %c0_i32, %c0_i32_0 : i32, i32
  }
  func.func @transform_15(%arg0: i32) -> (i32, i32) {
    %c0_i32 = arith.constant 0 : i32
    %c0_i32_0 = arith.constant 0 : i32
    %c0_i32_1 = arith.constant 0 : i32
    return %c0_i32, %c0_i32_0 : i32, i32
  }
  func.func @transform_16(%arg0: i32) -> (i32, i32) {
    %c0_i32 = arith.constant 0 : i32
    %c0_i32_0 = arith.constant 0 : i32
    %c0_i32_1 = arith.constant 0 : i32
    return %c0_i32, %c0_i32_0 : i32, i32
  }
  func.func @transform_17(%arg0: i32) -> (i32, i32) {
    %c0_i32 = arith.constant 0 : i32
    %c0_i32_0 = arith.constant 0 : i32
    %c0_i32_1 = arith.constant 0 : i32
    return %c0_i32, %c0_i32_0 : i32, i32
  }
  func.func @transform_18(%arg0: i32) -> (i32, i32, i32) {
    %c0_i32 = arith.constant 0 : i32
    %c0_i32_0 = arith.constant 0 : i32
    %c0_i32_1 = arith.constant 0 : i32
    return %arg0, %c0_i32, %c0_i32_0 : i32, i32, i32
  }
}

</mosaic_0001>

<bundles_post_ra>
// kernel: tpu_custom_call.1
= control target key start
LH: loop header
LB: loop body
LE: loop exit
PB: predicated region body
PF: predicated region fallthrough
CT: control target
= control target key end

     0   :  { %s4205_s0 = inlined_call_operand.vmem [shape: f32[2,8,32], index: 0, kind: input, shape index: {}]   ;;  %s4206_s1 = inlined_call_operand.vmem [shape: s32[2,1,8], index: 1, kind: input, shape index: {}]   ;;  %s4207_s2 = inlined_call_operand.vmem [shape: bf16[4,32,8], index: 2, kind: input, shape index: {}]   ;;  %s4208_s3 = inlined_call_operand.vmem [shape: f32[4,1,8], index: 3, kind: input, shape index: {}]   ;;  %s4209_s4 = inlined_call_operand.vmem [shape: bf16[4,32,8], index: 4, kind: input, shape index: {}]   ;;  %s4210_s5 = inlined_call_operand.vmem [shape: f32[4,1,8], index: 5, kind: input, shape index: {}]   ;;  %s4211_s6 = inlined_call_operand.vmem [shape: bf16[4,32,8], index: 6, kind: input, shape index: {}]   ;;  %s4212_s7 = inlined_call_operand.vmem [shape: f32[4,1,8], index: 7, kind: input, shape index: {}]   ;;  %s4213_s8 = inlined_call_operand.vmem [shape: bf16[4,8,32], index: 8, kind: input, shape index: {}]   ;;  %s4214_s9 = inlined_call_operand.vmem [shape: f32[1,32], index: 9, kind: input, shape index: {}]   ;;  %s4215_s10 = inlined_call_operand.vmem [shape: f32[1,32], index: 10, kind: input, shape index: {}]   ;;  %s4216_s11 = inlined_call_operand.vmem [shape: f32[1,32], index: 11, kind: input, shape index: {}]   ;;  %s4217_s12 = inlined_call_operand.vmem [shape: bf16[32,64], index: 12, kind: input, shape index: {}]   ;;  %s4218_s13 = inlined_call_operand.vmem [shape: f32[1,64], index: 13, kind: input, shape index: {}]   ;;  %s4219_s14 = inlined_call_operand.vmem [shape: bf16[64,32], index: 14, kind: input, shape index: {}]   ;;  %s4220_s15 = inlined_call_operand.vmem [shape: f32[1,32], index: 15, kind: input, shape index: {}]   ;;  %s4221_s16 = inlined_call_operand.vmem [shape: f32[1,32], index: 16, kind: input, shape index: {}]   ;;  %s4222_s17 = inlined_call_operand.vmem [shape: f32[1,32], index: 17, kind: input, shape index: {}]   ;;  %s4223_s18 = inlined_call_operand.hbm [shape: f32[2,8,128], index: 18, kind: output, shape index: {}]  }
   0x1   :  { %4227 = sst [smem:[#allocation5_spill]] %s4205_s0 }
   0x2   :  { %4228 = sst [smem:[#allocation6_spill]] %s4206_s1 }
   0x3   :  { %4229 = sst [smem:[#allocation7_spill]] %s4207_s2 }
   0x4   :  { %s4230_s29 = sld [smem:[#allocation7_spill]]  ;;  %v3543_v1 = vmov 0.0   ;;  %vm3544_vm0 = vmmov 0   ;;  %s4231_s23 = sld [smem:[#allocation5_spill]]  ;;  %vm121_vm1 = vcmask 261120  }
   0x5   :  { %3086 = vmatprep.subr.bf16.mxu0 %v3543_v1  ;;  %3094 = vmatprep.subr.bf16.mxu1 %v3543_v1 }
   0x6   :  { %3090 = vmatprep.mubr.msk.bf16.mxu0 %vm3544_vm0, %v3543_v1  ;;  %3098 = vmatprep.mubr.msk.bf16.mxu1 %vm3544_vm0, %v3543_v1 }
   0xa   :  { %v3447_v0 = vld [vmem:[%s4230_s29] sm:$0xff]   ;;  %v3448_v2 = vld [vmem:[%s4230_s29 + $0x10] sm:$0xff]   ;;  %v3449_v3 = vld [vmem:[%s4230_s29 + $0x8] sm:$0xff]  }
   0xb   :  { %3087 = vmatpush3.bf16.msra.mxu0 %v3447_v0  ;;  %3095 = vmatpush3.bf16.msra.mxu1 %v3448_v2  ;;  %v3450_v4 = vld [vmem:[%s4230_s29 + $0x18] sm:$0xff]   ;;  %v61_v5 = vld [vmem:[%s4231_s23] sm:$0xff]  ;;  %v3452_v8 = vld [vmem:[%s4230_s29 + $0x30] sm:$0xff]  }
   0xc   :  { %3088 = vmatprep.subr.bf16.mxu0 %v3543_v1  ;;  %3096 = vmatprep.subr.bf16.mxu1 %v3543_v1  ;;  %v3666_v6 = vpack.c.bf16 %v61_v5, %v61_v5  ;;  %v3451_v7 = vld [vmem:[%s4230_s29 + $0x20] sm:$0xff]   ;;  %v3453_v9 = vld [vmem:[%s4230_s29 + $0x28] sm:$0xff]   ;;  %v3454_v10 = vld [vmem:[%s4230_s29 + $0x38] sm:$0xff]  }
   0xd   :  { %v62_v11 = vld [vmem:[%s4231_s23 + $0x8] sm:$0xff] }
   0xe   :  { %v3707_v12 = vpack.c.bf16 %v62_v11, %v62_v11 }
   0xf   :  { %3089 = vmatpush3.bf16.msra.mxu0 %v3449_v3  ;;  %3097 = vmatpush3.bf16.msra.mxu1 %v3450_v4 }
  0x10   :  { %3102 = vmatprep.subr.bf16.mxu0 %v3543_v1  ;;  %3110 = vmatprep.subr.bf16.mxu1 %v3543_v1 }
  0x12   :  { %3091 = vmatmul.mubr.msk.bf16.vlgmr.msra.gmra.mrb[0].mxu0 %vm121_vm1, %v3666_v6  ;;  %3099 = vmatmul.mubr.msk.bf16.vlgmr.msra.gmra.mrb[0].mxu1 %vm121_vm1, %v3666_v6 }
  0x13   :  { %3103 = vmatpush3.bf16.msra.mxu0 %v3451_v7  ;;  %3111 = vmatpush3.bf16.msra.mxu1 %v3452_v8 }
  0x14   :  { %3104 = vmatprep.subr.bf16.mxu0 %v3543_v1  ;;  %3112 = vmatprep.subr.bf16.mxu1 %v3543_v1 }
  0x15   :  { %3106 = vmatprep.mubr.msk.bf16.mxu0 %vm3544_vm0, %v3543_v1  ;;  %3114 = vmatprep.mubr.msk.bf16.mxu1 %vm3544_vm0, %v3543_v1 }
  0x17   :  { %3105 = vmatpush3.bf16.msra.mxu0 %v3453_v9  ;;  %3113 = vmatpush3.bf16.msra.mxu1 %v3454_v10 }
  0x18   :  { %3118 = vmatprep.subr.bf16.mxu0 %v3543_v1  ;;  %3126 = vmatprep.subr.bf16.mxu1 %v3543_v1 }
  0x1a   :  { %3107 = vmatmul.mubr.msk.bf16.vlgmr.msra.gmra.mrb[4].mxu0 %vm121_vm1, %v3666_v6  ;;  %3115 = vmatmul.mubr.msk.bf16.vlgmr.msra.gmra.mrb[4].mxu1 %vm121_vm1, %v3666_v6 }
  0x1b   :  { %3119 = vmatpush3.bf16.msra.mxu0 %v3447_v0  ;;  %3127 = vmatpush3.bf16.msra.mxu1 %v3448_v2 }
  0x1c   :  { %3120 = vmatprep.subr.bf16.mxu0 %v3543_v1  ;;  %3128 = vmatprep.subr.bf16.mxu1 %v3543_v1 }
  0x1d   :  { %3122 = vmatprep.mubr.msk.bf16.mxu0 %vm3544_vm0, %v3543_v1  ;;  %3130 = vmatprep.mubr.msk.bf16.mxu1 %vm3544_vm0, %v3543_v1 }
  0x1f   :  { %3121 = vmatpush3.bf16.msra.mxu0 %v3449_v3  ;;  %3129 = vmatpush3.bf16.msra.mxu1 %v3450_v4 }
  0x20   :  { %3134 = vmatprep.subr.bf16.mxu0 %v3543_v1  ;;  %3142 = vmatprep.subr.bf16.mxu1 %v3543_v1 }
  0x22   :  { %3123 = vmatmul.mubr.msk.bf16.vlgmr.msra.gmra.mrb[8].mxu0 %vm121_vm1, %v3707_v12  ;;  %3131 = vmatmul.mubr.msk.bf16.vlgmr.msra.gmra.mrb[8].mxu1 %vm121_vm1, %v3707_v12 }
  0x23   :  { %3135 = vmatpush3.bf16.msra.mxu0 %v3451_v7 }
  0x24   :  { %23 = vsyncpa [#allocation3], 0  ;;  %3143 = vmatpush3.bf16.msra.mxu1 %v3452_v8  ;;  %3136 = vmatprep.subr.bf16.mxu0 %v3543_v1  ;;  %v3455_v13 = vld [vmem:[%s4209_s4] sm:$0xff]   ;;  %v3456_v14 = vld [vmem:[%s4209_s4 + $0x10] sm:$0xff]   ;;  %vm1324_vm2 = vcmask 64512   ;;  %vm1834_vm3 = vcmask 1043456  }
  0x25   :  { %3144 = vmatprep.subr.bf16.mxu1 %v3543_v1  ;;  %3138 = vmatprep.mubr.msk.bf16.mxu0 %vm3544_vm0, %v3543_v1  ;;  %v3457_v15 = vld [vmem:[%s4209_s4 + $0x8] sm:$0xff]   ;;  %v3458_v16 = vld [vmem:[%s4209_s4 + $0x18] sm:$0xff]   ;;  %v3459_v17 = vld [vmem:[%s4209_s4 + $0x20] sm:$0xff]   ;;  %s4232_s25 = sld [smem:[#allocation6_spill]]  ;;  %vm2748_vm6 = vcmask 523264  }
  0x26   :  { %3146 = vmatprep.mubr.msk.bf16.mxu1 %vm3544_vm0, %v3543_v1  ;;  %v3460_v18 = vld [vmem:[%s4209_s4 + $0x30] sm:$0xff]   ;;  %v3461_v19 = vld [vmem:[%s4209_s4 + $0x28] sm:$0xff]   ;;  %v3462_v20 = vld [vmem:[%s4209_s4 + $0x38] sm:$0xff]  }
  0x27   :  { %3137 = vmatpush3.bf16.msra.mxu0 %v3453_v9  ;;  %v3463_v21 = vld [vmem:[%s4211_s6] sm:$0xff]   ;;  %v3464_v22 = vld [vmem:[%s4211_s6 + $0x10] sm:$0xff]   ;;  %v3465_v23 = vld [vmem:[%s4211_s6 + $0x8] sm:$0xff]  }
  0x28   :  { %3145 = vmatpush3.bf16.msra.mxu1 %v3454_v10  ;;  %3150 = vmatprep.subr.bf16.mxu0 %v3543_v1  ;;  %v3466_v24 = vld [vmem:[%s4211_s6 + $0x18] sm:$0xff]   ;;  %v3467_v25 = vld [vmem:[%s4211_s6 + $0x20] sm:$0xff]   ;;  %v3468_v26 = vld [vmem:[%s4211_s6 + $0x30] sm:$0xff]  }
  0x29   :  { %3158 = vmatprep.subr.bf16.mxu1 %v3543_v1  ;;  %v3469_v27 = vld [vmem:[%s4211_s6 + $0x28] sm:$0xff]   ;;  %v3470_v28 = vld [vmem:[%s4211_s6 + $0x38] sm:$0xff]   ;;  %v2879_v61 = vld [vmem:[%s4210_s5] ss:$0 sm:$0xff] }
  0x2a   :  { %3139 = vmatmul.mubr.msk.bf16.vlgmr.msra.gmra.mrb[12].mxu0 %vm121_vm1, %v3707_v12  ;;  %v2880_v62 = vld [vmem:[%s4210_s5 + $0x1] ss:$0 sm:$0xff]  ;;  %v2859_v10 = vld [vmem:[%s4208_s3] ss:$0 sm:$0xff] }
  0x2b   :  { %3147 = vmatmul.mubr.msk.bf16.vlgmr.msra.gmra.mrb[12].mxu1 %vm121_vm1, %v3707_v12  ;;  %3151 = vmatpush3.bf16.msra.mxu0 %v3455_v13 }
  0x2c   :  { %3159 = vmatpush3.bf16.msra.mxu1 %v3456_v14  ;;  %3152 = vmatprep.subr.bf16.mxu0 %v3543_v1 }
  0x2d   :  { %3160 = vmatprep.subr.bf16.mxu1 %v3543_v1  ;;  %3154 = vmatprep.mubr.msk.bf16.mxu0 %vm3544_vm0, %v3543_v1 }
  0x2e   :  { %3162 = vmatprep.mubr.msk.bf16.mxu1 %vm3544_vm0, %v3543_v1 }
  0x2f   :  { %3153 = vmatpush3.bf16.msra.mxu0 %v3457_v15 }
  0x30   :  { %3161 = vmatpush3.bf16.msra.mxu1 %v3458_v16  ;;  %3166 = vmatprep.subr.bf16.mxu0 %v3543_v1 }
  0x31   :  { %3174 = vmatprep.subr.bf16.mxu1 %v3543_v1 }
  0x32   :  { %3155 = vmatmul.mubr.msk.bf16.vlgmr.msra.gmra.mrb[16].mxu0 %vm121_vm1, %v3666_v6 }
  0x33   :  { %3163 = vmatmul.mubr.msk.bf16.vlgmr.msra.gmra.mrb[16].mxu1 %vm121_vm1, %v3666_v6  ;;  %3167 = vmatpush3.bf16.msra.mxu0 %v3459_v17 }
  0x34   :  { %3175 = vmatpush3.bf16.msra.mxu1 %v3460_v18  ;;  %3168 = vmatprep.subr.bf16.mxu0 %v3543_v1 }
  0x35   :  { %3176 = vmatprep.subr.bf16.mxu1 %v3543_v1  ;;  %3170 = vmatprep.mubr.msk.bf16.mxu0 %vm3544_vm0, %v3543_v1 }
  0x36   :  { %3178 = vmatprep.mubr.msk.bf16.mxu1 %vm3544_vm0, %v3543_v1 }
  0x37   :  { %3169 = vmatpush3.bf16.msra.mxu0 %v3461_v19 }
  0x38   :  { %3177 = vmatpush3.bf16.msra.mxu1 %v3462_v20  ;;  %3182 = vmatprep.subr.bf16.mxu0 %v3543_v1 }
  0x39   :  { %3190 = vmatprep.subr.bf16.mxu1 %v3543_v1 }
  0x3a   :  { %3171 = vmatmul.mubr.msk.bf16.vlgmr.msra.gmra.mrb[20].mxu0 %vm121_vm1, %v3666_v6 }
  0x3b   :  { %3179 = vmatmul.mubr.msk.bf16.vlgmr.msra.gmra.mrb[20].mxu1 %vm121_vm1, %v3666_v6  ;;  %3183 = vmatpush3.bf16.msra.mxu0 %v3455_v13  ;;  %v2860_v13 = vld [vmem:[%s4208_s3 + $0x1] ss:$0 sm:$0xff] }
  0x3c   :  { %3191 = vmatpush3.bf16.msra.mxu1 %v3456_v14  ;;  %3184 = vmatprep.subr.bf16.mxu0 %v3543_v1 }
  0x3d   :  { %3192 = vmatprep.subr.bf16.mxu1 %v3543_v1  ;;  %3186 = vmatprep.mubr.msk.bf16.mxu0 %vm3544_vm0, %v3543_v1 }
  0x3e   :  { %3194 = vmatprep.mubr.msk.bf16.mxu1 %vm3544_vm0, %v3543_v1 }
  0x3f   :  { %3185 = vmatpush3.bf16.msra.mxu0 %v3457_v15 }
  0x40   :  { %3193 = vmatpush3.bf16.msra.mxu1 %v3458_v16  ;;  %3198 = vmatprep.subr.bf16.mxu0 %v3543_v1  ;;  %v2881_v16 = vld [vmem:[%s4210_s5 + $0x2] ss:$0 sm:$0xff] }
  0x41   :  { %3206 = vmatprep.subr.bf16.mxu1 %v3543_v1 }
  0x42   :  { %3187 = vmatmul.mubr.msk.bf16.vlgmr.msra.gmra.mrb[24].mxu0 %vm121_vm1, %v3707_v12 }
  0x43   :  { %3195 = vmatmul.mubr.msk.bf16.vlgmr.msra.gmra.mrb[24].mxu1 %vm121_vm1, %v3707_v12  ;;  %3199 = vmatpush3.bf16.msra.mxu0 %v3459_v17 }
  0x44   :  { %3207 = vmatpush3.bf16.msra.mxu1 %v3460_v18  ;;  %3200 = vmatprep.subr.bf16.mxu0 %v3543_v1  ;;  %v2882_v18 = vld [vmem:[%s4210_s5 + $0x3] ss:$0 sm:$0xff] }
  0x45   :  { %3208 = vmatprep.subr.bf16.mxu1 %v3543_v1  ;;  %3202 = vmatprep.mubr.msk.bf16.mxu0 %vm3544_vm0, %v3543_v1 }
  0x46   :  { %3210 = vmatprep.mubr.msk.bf16.mxu1 %vm3544_vm0, %v3543_v1 }
  0x47   :  { %3201 = vmatpush3.bf16.msra.mxu0 %v3461_v19 }
  0x48   :  { %3209 = vmatpush3.bf16.msra.mxu1 %v3462_v20  ;;  %3214 = vmatprep.subr.bf16.mxu0 %v3543_v1 }
  0x49   :  { %3222 = vmatprep.subr.bf16.mxu1 %v3543_v1 }
  0x4a   :  { %3203 = vmatmul.mubr.msk.bf16.vlgmr.msra.gmra.mrb[28].mxu0 %vm121_vm1, %v3707_v12 }
  0x4b   :  { %3211 = vmatmul.mubr.msk.bf16.vlgmr.msra.gmra.mrb[28].mxu1 %vm121_vm1, %v3707_v12  ;;  %3215 = vmatpush3.bf16.msra.mxu0 %v3463_v21 }
  0x4c   :  { %3216 = vmatprep.subr.bf16.mxu0 %v3543_v1  ;;  %3218 = vmatprep.mubr.msk.bf16.mxu0 %vm3544_vm0, %v3543_v1 }
  0x4d   :  { %3226 = vmatprep.mubr.msk.bf16.mxu1 %vm3544_vm0, %v3543_v1  ;;  %3223 = vmatpush3.bf16.msra.mxu1 %v3464_v22 }
  0x4e   :  { %3224 = vmatprep.subr.bf16.mxu1 %v3543_v1 }
  0x4f   :  { %3217 = vmatpush3.bf16.msra.mxu0 %v3465_v23 }
  0x50   :  { %3230 = vmatprep.subr.bf16.mxu0 %v3543_v1 }
  0x51   :  { %3225 = vmatpush3.bf16.msra.mxu1 %v3466_v24 }
  0x52   :  { %3219 = vmatmul.mubr.msk.bf16.vlgmr.msra.gmra.mrb[32].mxu0 %vm121_vm1, %v3666_v6  ;;  %3238 = vmatprep.subr.bf16.mxu1 %v3543_v1 }
  0x53   :  { %3231 = vmatpush3.bf16.msra.mxu0 %v3467_v25  ;;  %3234 = vmatprep.mubr.msk.bf16.mxu0 %vm3544_vm0, %v3543_v1 }
  0x54   :  { %3227 = vmatmul.mubr.msk.bf16.vlgmr.msra.gmra.mrb[32].mxu1 %vm121_vm1, %v3666_v6  ;;  %3232 = vmatprep.subr.bf16.mxu0 %v3543_v1 }
  0x55   :  { %3239 = vmatpush3.bf16.msra.mxu1 %v3468_v26  ;;  %3242 = vmatprep.mubr.msk.bf16.mxu1 %vm3544_vm0, %v3543_v1 }
  0x56   :  { %3240 = vmatprep.subr.bf16.mxu1 %v3543_v1 }
  0x57   :  { %3233 = vmatpush3.bf16.msra.mxu0 %v3469_v27 }
  0x58   :  { %3246 = vmatprep.subr.bf16.mxu0 %v3543_v1 }
  0x59   :  { %3241 = vmatpush3.bf16.msra.mxu1 %v3470_v28 }
  0x5a   :  { %3235 = vmatmul.mubr.msk.bf16.vlgmr.msra.gmra.mrb[36].mxu0 %vm121_vm1, %v3666_v6  ;;  %3254 = vmatprep.subr.bf16.mxu1 %v3543_v1 }
  0x5b   :  { %3247 = vmatpush3.bf16.msra.mxu0 %v3463_v21  ;;  %3250 = vmatprep.mubr.msk.bf16.mxu0 %vm3544_vm0, %v3543_v1 }
  0x5c   :  { %3243 = vmatmul.mubr.msk.bf16.vlgmr.msra.gmra.mrb[36].mxu1 %vm121_vm1, %v3666_v6  ;;  %3248 = vmatprep.subr.bf16.mxu0 %v3543_v1 }
  0x5d   :  { %3255 = vmatpush3.bf16.msra.mxu1 %v3464_v22  ;;  %3258 = vmatprep.mubr.msk.bf16.mxu1 %vm3544_vm0, %v3543_v1 }
  0x5e   :  { %3256 = vmatprep.subr.bf16.mxu1 %v3543_v1 }
  0x5f   :  { %3249 = vmatpush3.bf16.msra.mxu0 %v3465_v23 }
  0x60   :  { %3262 = vmatprep.subr.bf16.mxu0 %v3543_v1 }
  0x61   :  { %3257 = vmatpush3.bf16.msra.mxu1 %v3466_v24 }
  0x62   :  { %3251 = vmatmul.mubr.msk.bf16.vlgmr.msra.gmra.mrb[40].mxu0 %vm121_vm1, %v3707_v12  ;;  %3270 = vmatprep.subr.bf16.mxu1 %v3543_v1 }
  0x63   :  { %3263 = vmatpush3.bf16.msra.mxu0 %v3467_v25  ;;  %3266 = vmatprep.mubr.msk.bf16.mxu0 %vm3544_vm0, %v3543_v1 }
  0x64   :  { %3259 = vmatmul.mubr.msk.bf16.vlgmr.msra.gmra.mrb[40].mxu1 %vm121_vm1, %v3707_v12  ;;  %3264 = vmatprep.subr.bf16.mxu0 %v3543_v1 }
  0x65   :  { %3271 = vmatpush3.bf16.msra.mxu1 %v3468_v26  ;;  %3274 = vmatprep.mubr.msk.bf16.mxu1 %vm3544_vm0, %v3543_v1 }
  0x66   :  { %3272 = vmatprep.subr.bf16.mxu1 %v3543_v1 }
  0x67   :  { %3265 = vmatpush3.bf16.msra.mxu0 %v3469_v27 }
  0x68   :  { %3278 = vmatprep.subr.bf16.mxu0 %v3543_v1 }
  0x69   :  { %3273 = vmatpush3.bf16.msra.mxu1 %v3470_v28 }
  0x6a   :  { %3267 = vmatmul.mubr.msk.bf16.vlgmr.msra.gmra.mrb[44].mxu0 %vm121_vm1, %v3707_v12  ;;  %3284 = vmatprep.subr.bf16.mxu1 %v3543_v1 }
  0x6b   :  { %3280 = vmatprep.mubr.msk.bf16.mxu0 %vm3544_vm0, %v3543_v1 }
  0x6c   :  { %3275 = vmatmul.mubr.msk.bf16.vlgmr.msra.gmra.mrb[44].mxu1 %vm121_vm1, %v3707_v12 }
  0x6d   :  { %3286 = vmatprep.mubr.msk.bf16.mxu1 %vm3544_vm0, %v3543_v1 }
  0xe5   :  { %v159_v29 = vpop.f32.mrb[0].mxu0  ;;  %v211_v31 = vpop.f32.mrb[0].mxu1 }
  0xe6   :  { %v3092_v30 = vpop.f32.mrb[1].mxu0  ;;  %v3100_v33 = vpop.f32.mrb[1].mxu1  ;;  %v160_v17 = vadd.f32 %v2859_v10, %v159_v29  ;;  %v212_v19 = vadd.f32 %v2860_v13, %v211_v31 }
  0xe7   :  { %v162_v32 = vpop.f32.mrb[2].mxu0  ;;  %v214_v35 = vpop.f32.mrb[2].mxu1  ;;  %v2861_v33 = vld [vmem:[%s4208_s3 + $0x2] ss:$0 sm:$0xff] }
  0xe8   :  { %v3093_v34 = vpop.f32.mrb[3].mxu0  ;;  %v3101_v36 = vpop.f32.mrb[3].mxu1  ;;  %v1308_v27 = vpack.c.bf16 %v160_v17, %v160_v17  ;;  %v1309_v32 = vpack.c.bf16 %v212_v19, %v212_v19  ;;  %v2862_v35 = vld [vmem:[%s4208_s3 + $0x3] ss:$0 sm:$0xff]  ;;  %v2900_v17 = vld [vmem:[%s4212_s7 + $0x1] ss:$0 sm:$0xff] }
  0xed   :  { %v3875_v37 = vpop.f32.mrb[4].mxu0  ;;  %v3877_v39 = vpop.f32.mrb[4].mxu1 }
  0xee   :  { %v3108_v38 = vpop.f32.mrb[5].mxu0  ;;  %v3116_v41 = vpop.f32.mrb[5].mxu1 }
  0xef   :  { %v266_v40 = vpop.f32.mrb[6].mxu0  ;;  %v318_v43 = vpop.f32.mrb[6].mxu1  ;;  %v316_v41 = vadd.f32 %v2862_v35, %v3877_v39 }
  0xf0   :  { %v3109_v42 = vpop.f32.mrb[7].mxu0  ;;  %v3117_v44 = vpop.f32.mrb[7].mxu1  ;;  %v264_v40 = vadd.f32 %v2861_v33, %v3875_v37 }
  0xf5   :  { %v3879_v45 = vpop.f32.mrb[8].mxu0  ;;  %v3881_v47 = vpop.f32.mrb[8].mxu1 }
  0xf6   :  { %v3124_v46 = vpop.f32.mrb[9].mxu0  ;;  %v3132_v49 = vpop.f32.mrb[9].mxu1 }
  0xf7   :  { %v361_v48 = vpop.f32.mrb[10].mxu0  ;;  %v401_v51 = vpop.f32.mrb[10].mxu1 }
  0xf8   :  { %v3125_v50 = vpop.f32.mrb[11].mxu0  ;;  %v3133_v52 = vpop.f32.mrb[11].mxu1 }
  0xf9   :  { %v1310_v50 = vpack.c.bf16 %v264_v40, %v264_v40 }
  0xfd   :  { %v3883_v53 = vpop.f32.mrb[12].mxu0 }
  0xfe   :  { %v3140_v54 = vpop.f32.mrb[13].mxu0  ;;  %v3885_v55 = vpop.f32.mrb[12].mxu1 }
  0xff   :  { %v441_v56 = vpop.f32.mrb[14].mxu0  ;;  %v3148_v57 = vpop.f32.mrb[13].mxu1 }
 0x100   :  { %v3141_v58 = vpop.f32.mrb[15].mxu0  ;;  %v481_v59 = vpop.f32.mrb[14].mxu1  ;;  %v1311_v56 = vpack.c.bf16 %v316_v41, %v316_v41 }
 0x101   :  { %v3149_v60 = vpop.f32.mrb[15].mxu1 }
 0x102   :  { %v359_v60 = vadd.f32 %v2859_v10, %v3879_v45 }
 0x105   :  { %v574_v63 = vpop.f32.mrb[16].mxu0 }
 0x106   :  { %v575_v0 = vadd.f32 %v2879_v61, %v574_v63  ;;  %v626_v2 = vpop.f32.mrb[16].mxu1  ;;  %v3156_v3 = vpop.f32.mrb[17].mxu0 }
 0x107   :  { %v627_v4 = vadd.f32 %v2880_v62, %v626_v2  ;;  %v577_v5 = vpop.f32.mrb[18].mxu0  ;;  %v3164_v6 = vpop.f32.mrb[17].mxu1 }
 0x108   :  { %v1316_v7 = vpack.c.bf16 %v575_v0, %v575_v0  ;;  %v3157_v8 = vpop.f32.mrb[19].mxu0  ;;  %v629_v9 = vpop.f32.mrb[18].mxu1  ;;  %v1312_v5 = vpack.c.bf16 %v359_v60, %v359_v60 }
 0x109   :  { %v1317_v11 = vpack.c.bf16 %v627_v4, %v627_v4  ;;  %v3165_v12 = vpop.f32.mrb[19].mxu1 }
 0x10a   :  { %v1329_v14 = vsel %vm1324_vm2, %v1316_v7, 0 }
 0x10b   :  { %v1375_v15 = vsel %vm1324_vm2, %v1317_v11, 0  ;;  %3279 = vmatpush3.bf16.xpose.msra.mxu0 %v1329_v14  ;;  %v479_v14 = vadd.f32 %v2862_v35, %v3885_v55 }
 0x10c   :  { %3285 = vmatpush3.bf16.xpose.msra.mxu1 %v1375_v15  ;;  %3290 = vmatprep.subr.bf16.mxu0 %v3543_v1 }
 0x10d   :  { %v678_v20 = vpop.f32.mrb[20].mxu0  ;;  %3296 = vmatprep.subr.bf16.mxu1 %v3543_v1 }
 0x10e   :  { %v679_v21 = vadd.f32 %v2881_v16, %v678_v20  ;;  %v730_v22 = vpop.f32.mrb[20].mxu1  ;;  %v3172_v23 = vpop.f32.mrb[21].mxu0 }
 0x10f   :  { %v731_v24 = vadd.f32 %v2882_v18, %v730_v22  ;;  %v681_v25 = vpop.f32.mrb[22].mxu0  ;;  %v3180_v26 = vpop.f32.mrb[21].mxu1 }
 0x110   :  { %v1318_v28 = vpack.c.bf16 %v679_v21, %v679_v21  ;;  %v3173_v29 = vpop.f32.mrb[23].mxu0  ;;  %v733_v30 = vpop.f32.mrb[22].mxu1 }
 0x111   :  { %v1319_v34 = vpack.c.bf16 %v731_v24, %v731_v24  ;;  %v3181_v31 = vpop.f32.mrb[23].mxu1 }
 0x112   :  { %v1421_v36 = vsel %vm1324_vm2, %v1318_v28, 0  ;;  %3281 = vmatmul.mubr.msk.bf16.vlgmr.msra.gmra.mrb[48].mxu0 %vm1324_vm2, %v1308_v27 }
 0x113   :  { %v1467_v38 = vsel %vm1324_vm2, %v1319_v34, 0  ;;  %3287 = vmatmul.mubr.msk.bf16.vlgmr.msra.gmra.mrb[48].mxu1 %vm1324_vm2, %v1309_v32  ;;  %3291 = vmatpush3.bf16.xpose.msra.mxu0 %v1421_v36 }
 0x114   :  { %3297 = vmatpush3.bf16.xpose.msra.mxu1 %v1467_v38  ;;  %3292 = vmatprep.mubr.msk.bf16.mxu0 %vm3544_vm0, %v3543_v1 }
 0x115   :  { %v770_v42 = vpop.f32.mrb[24].mxu0  ;;  %3298 = vmatprep.mubr.msk.bf16.mxu1 %vm3544_vm0, %v3543_v1  ;;  %3302 = vmatprep.subr.bf16.mxu0 %v3543_v1 }
 0x116   :  { %v771_v43 = vadd.f32 %v2879_v61, %v770_v42  ;;  %v810_v44 = vpop.f32.mrb[24].mxu1  ;;  %v3188_v46 = vpop.f32.mrb[25].mxu0  ;;  %3308 = vmatprep.subr.bf16.mxu1 %v3543_v1  ;;  %v399_v61 = vadd.f32 %v2860_v13, %v3881_v47  ;;  %v439_v13 = vadd.f32 %v2861_v33, %v3883_v53  ;;  %v2899_v53 = vld [vmem:[%s4212_s7] ss:$0 sm:$0xff] }
 0x117   :  { %v811_v48 = vadd.f32 %v2880_v62, %v810_v44  ;;  %v773_v49 = vpop.f32.mrb[26].mxu0  ;;  %v3196_v37 = vpop.f32.mrb[25].mxu1 }
 0x118   :  { %v1320_v51 = vpack.c.bf16 %v771_v43, %v771_v43  ;;  %v3189_v52 = vpop.f32.mrb[27].mxu0  ;;  %v813_v54 = vpop.f32.mrb[26].mxu1  ;;  %v1313_v9 = vpack.c.bf16 %v399_v61, %v399_v61  ;;  %v1314_v15 = vpack.c.bf16 %v439_v13, %v439_v13  ;;  %v1709_v61 = vlaneseq }
 0x119   :  { %v1321_v39 = vpack.c.bf16 %v811_v48, %v811_v48  ;;  %v3197_v57 = vpop.f32.mrb[27].mxu1 }
 0x11a   :  { %v1513_v58 = vsel %vm1324_vm2, %v1320_v51, 0  ;;  %3293 = vmatmul.mubr.msk.bf16.vlgmr.msra.gmra.mrb[52].mxu0 %vm1324_vm2, %v1310_v50 }
 0x11b   :  { %v1559_v59 = vsel %vm1324_vm2, %v1321_v39, 0  ;;  %3299 = vmatmul.mubr.msk.bf16.vlgmr.msra.gmra.mrb[52].mxu1 %vm1324_vm2, %v1311_v56  ;;  %3303 = vmatpush3.bf16.xpose.msra.mxu0 %v1513_v58 }
 0x11c   :  { %3309 = vmatpush3.bf16.xpose.msra.mxu1 %v1559_v59  ;;  %3304 = vmatprep.mubr.msk.bf16.mxu0 %vm3544_vm0, %v3543_v1 }
 0x11d   :  { %v850_v62 = vpop.f32.mrb[28].mxu0  ;;  %3310 = vmatprep.mubr.msk.bf16.mxu1 %vm3544_vm0, %v3543_v1  ;;  %3314 = vmatprep.subr.bf16.mxu0 %v3543_v1 }
 0x11e   :  { %v851_v63 = vadd.f32 %v2881_v16, %v850_v62  ;;  %v890_v0 = vpop.f32.mrb[28].mxu1  ;;  %v3204_v2 = vpop.f32.mrb[29].mxu0  ;;  %3320 = vmatprep.subr.bf16.mxu1 %v3543_v1  ;;  %v1315_v16 = vpack.c.bf16 %v479_v14, %v479_v14  ;;  %v1701_v62 = vld [vmem:[%s4232_s25] sm:$0x1] }
 0x11f   :  { %v891_v3 = vadd.f32 %v2882_v18, %v890_v0  ;;  %v853_v4 = vpop.f32.mrb[30].mxu0  ;;  %v3212_v45 = vpop.f32.mrb[29].mxu1  ;;  %vm1703_vm4 = vcmp.eq.s32.totalorder %v1701_v62, 0 }
 0x120   :  { %v1322_v6 = vpack.c.bf16 %v851_v63, %v851_v63  ;;  %v3205_v7 = vpop.f32.mrb[31].mxu0  ;;  %v893_v8 = vpop.f32.mrb[30].mxu1  ;;  %v1710_v63 = vshrl.u32 %v1709_v61, 7  ;;  %v1705_v2 = vsel %vm1703_vm4, -1e+09, %v3543_v1 }
 0x121   :  { %v1323_v47 = vpack.c.bf16 %v891_v3, %v891_v3  ;;  %v3213_v10 = vpop.f32.mrb[31].mxu1 }
 0x122   :  { %v1605_v11 = vsel %vm1324_vm2, %v1322_v6, 0  ;;  %3305 = vmatmul.mubr.msk.bf16.vlgmr.msra.gmra.mrb[56].mxu0 %vm1324_vm2, %v1312_v5  ;;  %v1711_v0 = vsub.s32 0, %v1710_v63 }
 0x123   :  { %v1651_v12 = vsel %vm1324_vm2, %v1323_v47, 0  ;;  %3311 = vmatmul.mubr.msk.bf16.vlgmr.msra.gmra.mrb[56].mxu1 %vm1324_vm2, %v1313_v9  ;;  %3315 = vmatpush3.bf16.xpose.msra.mxu0 %v1605_v11 }
 0x124   :  { %3321 = vmatpush3.bf16.xpose.msra.mxu1 %v1651_v12  ;;  %3316 = vmatprep.mubr.msk.bf16.mxu0 %vm3544_vm0, %v3543_v1  ;;  %v1712_v3 = vrot.slane %v1705_v2, %v1711_v0 }
 0x125   :  { %3322 = vmatprep.mubr.msk.bf16.mxu1 %vm3544_vm0, %v3543_v1  ;;  %3326 = vmatprep.subr.bf16.mxu0 %v3543_v1  ;;  %v986_v55 = vpop.f32.mrb[32].mxu0 }
 0x126   :  { %3332 = vmatprep.subr.bf16.mxu1 %v3543_v1  ;;  %v987_v18 = vadd.f32 %v2899_v53, %v986_v55  ;;  %v3220_v19 = vpop.f32.mrb[33].mxu0 }
 0x127   :  { %v989_v20 = vpop.f32.mrb[34].mxu0  ;;  %v1038_v21 = vpop.f32.mrb[32].mxu1 }
 0x128   :  { %v1823_v22 = vpack.c.bf16 %v987_v18, %v987_v18  ;;  %v3221_v23 = vpop.f32.mrb[35].mxu0  ;;  %v1039_v24 = vadd.f32 %v2900_v17, %v1038_v21  ;;  %v3228_v25 = vpop.f32.mrb[33].mxu1 }
 0x129   :  { %v1041_v26 = vpop.f32.mrb[34].mxu1 }
 0x12a   :  { %3317 = vmatmul.mubr.msk.bf16.vlgmr.msra.gmra.mrb[60].mxu0 %vm1324_vm2, %v1314_v15  ;;  %v1836_v27 = vsel %vm1834_vm3, %v1823_v22, 0  ;;  %v1824_v28 = vpack.c.bf16 %v1039_v24, %v1039_v24  ;;  %v3229_v29 = vpop.f32.mrb[35].mxu1  ;;  %v1702_v15 = vld [vmem:[%s4232_s25 + $0x1] sm:$0x1] }
 0x12b   :  { %3323 = vmatmul.mubr.msk.bf16.vlgmr.msra.gmra.mrb[60].mxu1 %vm1324_vm2, %v1315_v16  ;;  %3328 = vmatprep.mubr.msk.bf16.mxu0 %vm3544_vm0, %v3543_v1  ;;  %vm1704_vm5 = vcmp.eq.s32.totalorder %v1702_v15, 0 }
 0x12c   :  { %3334 = vmatprep.mubr.msk.bf16.mxu1 %vm3544_vm0, %v3543_v1  ;;  %3327 = vmatpush3.bf16.msra.mxu0 %v1836_v27  ;;  %v1882_v30 = vsel %vm1834_vm3, %v1824_v28, 0  ;;  %v1706_v26 = vsel %vm1704_vm5, -1e+09, %v3543_v1 }
 0x12d   :  { %3338 = vmatprep.subr.bf16.mxu0 %v3543_v1  ;;  %v3966_v32 = vpop.f32.mrb[36].mxu0  ;;  %3333 = vmatpush3.bf16.msra.mxu1 %v1882_v30  ;;  %v1716_v29 = vrot.slane %v1706_v26, %v1711_v0 }
 0x12e   :  { %v3236_v33 = vpop.f32.mrb[37].mxu0  ;;  %3344 = vmatprep.subr.bf16.mxu1 %v3543_v1 }
 0x12f   :  { %v1093_v34 = vpop.f32.mrb[38].mxu0  ;;  %v3969_v31 = vpop.f32.mrb[36].mxu1 }
 0x130   :  { %v3237_v35 = vpop.f32.mrb[39].mxu0  ;;  %v3244_v36 = vpop.f32.mrb[37].mxu1 }
 0x131   :  { %v1145_v38 = vpop.f32.mrb[38].mxu1 }
 0x132   :  { %v3245_v40 = vpop.f32.mrb[39].mxu1 }
 0x135   :  { %v1182_v41 = vpop.f32.mrb[40].mxu0 }
 0x136   :  { %v3971_v42 = vadd.f32 %v2899_v53, %v1182_v41  ;;  %v3252_v43 = vpop.f32.mrb[41].mxu0 }
 0x137   :  { %v1185_v44 = vpop.f32.mrb[42].mxu0  ;;  %v1222_v46 = vpop.f32.mrb[40].mxu1 }
 0x138   :  { %v3253_v48 = vpop.f32.mrb[43].mxu0  ;;  %v3973_v49 = vadd.f32 %v2900_v17, %v1222_v46  ;;  %v3260_v37 = vpop.f32.mrb[41].mxu1 }
 0x139   :  { %v1225_v50 = vpop.f32.mrb[42].mxu1 }
 0x13a   :  { %v3261_v51 = vpop.f32.mrb[43].mxu1 }
 0x13d   :  { %v3975_v52 = vpop.f32.mrb[44].mxu0 }
 0x13e   :  { %v3268_v54 = vpop.f32.mrb[45].mxu0 }
 0x13f   :  { %v1265_v56 = vpop.f32.mrb[46].mxu0  ;;  %v3977_v39 = vpop.f32.mrb[44].mxu1 }
 0x140   :  { %v3269_v57 = vpop.f32.mrb[47].mxu0  ;;  %v3276_v58 = vpop.f32.mrb[45].mxu1 }
 0x141   :  { %v1305_v59 = vpop.f32.mrb[46].mxu1 }
 0x142   :  { %v3277_v60 = vpop.f32.mrb[47].mxu1 }
 0x1e5   :  { %v1365_v4 = vpop.f32.mrb[48].mxu0 }
 0x1e6   :  { %v1693_v45 = vmul.f32 0.35355338, %v1365_v4  ;;  %v1411_v5 = vpop.f32.mrb[48].mxu1  ;;  %v3282_v6 = vpop.f32.mrb[49].mxu0 }
 0x1e7   :  { %v1694_v7 = vmul.f32 0.35355338, %v1411_v5  ;;  %v3288_v8 = vpop.f32.mrb[49].mxu1  ;;  %v1368_v9 = vpop.f32.mrb[50].mxu0 }
 0x1e8   :  { %v1414_v47 = vpop.f32.mrb[50].mxu1  ;;  %v3283_v10 = vpop.f32.mrb[51].mxu0  ;;  %v1719_v11 = vadd.f32 %v1712_v3, %v1693_v45 }
 0x1e9   :  { %v3289_v12 = vpop.f32.mrb[51].mxu1  ;;  %v1720_v14 = vadd.f32 %v1712_v3, %v1694_v7 }
 0x1ea   :  { %v1727_v13 = vsel %vm1324_vm2, %v1719_v11, -inf }
 0x1eb   :  { %1728 = vmax.xlane.f32.xlu0 %v1727_v13  ;;  %v1730_v18 = vsel %vm1324_vm2, %v1720_v14, -inf }
 0x1ed   :  { %v1457_v16 = vpop.f32.mrb[52].mxu0 }
 0x1ee   :  { %v1695_v53 = vmul.f32 0.35355338, %v1457_v16  ;;  %v1503_v55 = vpop.f32.mrb[52].mxu1  ;;  %v3294_v17 = vpop.f32.mrb[53].mxu0 }
 0x1ef   :  { %v1696_v19 = vmul.f32 0.35355338, %v1503_v55  ;;  %v3300_v20 = vpop.f32.mrb[53].mxu1  ;;  %1731 = vmax.xlane.f32.xlu0 %v1730_v18  ;;  %v1460_v21 = vpop.f32.mrb[54].mxu0 }
 0x1f0   :  { %v1506_v22 = vpop.f32.mrb[54].mxu1  ;;  %v3295_v23 = vpop.f32.mrb[55].mxu0  ;;  %v1721_v24 = vadd.f32 %v1712_v3, %v1695_v53 }
 0x1f1   :  { %v3301_v25 = vpop.f32.mrb[55].mxu1  ;;  %v1722_v28 = vadd.f32 %v1712_v3, %v1696_v19 }
 0x1f2   :  { %v1733_v27 = vsel %vm1324_vm2, %v1721_v24, -inf }
 0x1f3   :  { %1734 = vmax.xlane.f32.xlu1 %v1733_v27  ;;  %v1736_v36 = vsel %vm1324_vm2, %v1722_v28, -inf }
 0x1f5   :  { %v1549_v30 = vpop.f32.mrb[56].mxu0 }
 0x1f6   :  { %v1697_v33 = vmul.f32 0.35355338, %v1549_v30  ;;  %v1595_v34 = vpop.f32.mrb[56].mxu1  ;;  %v3306_v35 = vpop.f32.mrb[57].mxu0 }
 0x1f7   :  { %v1698_v38 = vmul.f32 0.35355338, %v1595_v34  ;;  %v3312_v40 = vpop.f32.mrb[57].mxu1  ;;  %1737 = vmax.xlane.f32.xlu1 %v1736_v36  ;;  %v1552_v41 = vpop.f32.mrb[58].mxu0 }
 0x1f8   :  { %v1598_v43 = vpop.f32.mrb[58].mxu1  ;;  %v3307_v44 = vpop.f32.mrb[59].mxu0  ;;  %v1723_v46 = vadd.f32 %v1716_v29, %v1697_v33 }
 0x1f9   :  { %v3313_v48 = vpop.f32.mrb[59].mxu1  ;;  %v1724_v37 = vadd.f32 %v1716_v29, %v1698_v38 }
 0x1fa   :  { %v1739_v50 = vsel %vm1324_vm2, %v1723_v46, -inf }
 0x1fb   :  { %v1742_v51 = vsel %vm1324_vm2, %v1724_v37, -inf  ;;  %1740 = vmax.xlane.f32.xlu0 %v1739_v50 }
 0x1fc   :  { %1743 = vmax.xlane.f32.xlu1 %v1742_v51  ;;  %v2901_v51 = vld [vmem:[%s4212_s7 + $0x2] ss:$0 sm:$0xff] }
 0x1fd   :  { %v1641_v54 = vpop.f32.mrb[60].mxu0 }
 0x1fe   :  { %v1699_v56 = vmul.f32 0.35355338, %v1641_v54  ;;  %v1687_v57 = vpop.f32.mrb[60].mxu1  ;;  %v3318_v58 = vpop.f32.mrb[61].mxu0  ;;  %v1091_v54 = vadd.f32 %v2901_v51, %v3966_v32 }
 0x1ff   :  { %v1700_v59 = vmul.f32 0.35355338, %v1687_v57  ;;  %v3324_v60 = vpop.f32.mrb[61].mxu1  ;;  %v1644_v61 = vpop.f32.mrb[62].mxu0  ;;  %v2902_v57 = vld [vmem:[%s4212_s7 + $0x3] ss:$0 sm:$0xff] }
 0x200   :  { %v1690_v62 = vpop.f32.mrb[62].mxu1  ;;  %v3319_v63 = vpop.f32.mrb[63].mxu0  ;;  %v1725_v0 = vadd.f32 %v1716_v29, %v1699_v56  ;;  %v1143_v60 = vadd.f32 %v2902_v57, %v3969_v31 }
 0x201   :  { %v3325_v2 = vpop.f32.mrb[63].mxu1  ;;  %v1726_v3 = vadd.f32 %v1716_v29, %v1700_v59  ;;  %v1825_v59 = vpack.c.bf16 %v1091_v54, %v1091_v54 }
 0x202   :  { %v1745_v4 = vsel %vm1324_vm2, %v1725_v0, -inf }
 0x203   :  { %v1748_v45 = vsel %vm1324_vm2, %v1726_v3, -inf  ;;  %1746 = vmax.xlane.f32.xlu0 %v1745_v4  ;;  %v1928_v2 = vsel %vm1834_vm3, %v1825_v59, 0 }
 0x204   :  { %1749 = vmax.xlane.f32.xlu1 %v1748_v45 }
 0x278   :  { %v1729_v5 = vpop.xlane.xlu0 %1728 }
 0x279   :  { %v1751_v6 = vsub.f32 %v1719_v11, %v1729_v5 }
 0x27b   :  { %v1759_v7 = vmul.f32 1.442695, %v1751_v6 }
 0x27c   :  { %v1732_v8 = vpop.xlane.xlu0 %1731 }
 0x27d   :  { %3477 = vpow2.f32 %v1759_v7  ;;  %v1752_v9 = vsub.f32 %v1720_v14, %v1732_v8  ;;  %v1827_v7 = vpack.c.bf16 %v3971_v42, %v3971_v42 }
 0x27f   :  { %v1761_v47 = vmul.f32 1.442695, %v1752_v9 }
 0x280   :  { %v1735_v10 = vpop.xlane.xlu1 %1734 }
 0x281   :  { %3479 = vpow2.f32 %v1761_v47  ;;  %v1753_v12 = vsub.f32 %v1721_v24, %v1735_v10  ;;  %v2020_v10 = vsel %vm1834_vm3, %v1827_v7, 0 }
 0x283   :  { %v1763_v13 = vmul.f32 1.442695, %v1753_v12  ;;  %v1828_v12 = vpack.c.bf16 %v3973_v49, %v3973_v49 }
 0x284   :  { %v1738_v15 = vpop.xlane.xlu1 %1737 }
 0x285   :  { %3481 = vpow2.f32 %v1763_v13  ;;  %v1754_v16 = vsub.f32 %v1722_v28, %v1738_v15  ;;  %v1263_v13 = vadd.f32 %v2901_v51, %v3975_v52  ;;  %v2066_v49 = vsel %vm1834_vm3, %v1828_v12, 0 }
 0x286   :  { %v1303_v52 = vadd.f32 %v2902_v57, %v3977_v39 }
 0x287   :  { %v3478_v53 = vpop.eup %3477  ;;  %v1765_v55 = vmul.f32 1.442695, %v1754_v16 }
 0x288   :  { %v1741_v17 = vpop.xlane.xlu0 %1740  ;;  %v1775_v18 = vsel %vm1324_vm2, %v3478_v53, 0.0 }
 0x289   :  { %3483 = vpow2.f32 %v1765_v55  ;;  %v1744_v19 = vpop.xlane.xlu1 %1743  ;;  %v1755_v11 = vsub.f32 %v1723_v46, %v1741_v17  ;;  %1776 = vadd.xlane.f32.xlu0 %v1775_v18  ;;  %v1829_v18 = vpack.c.bf16 %v1263_v13, %v1263_v13 }
 0x28a   :  { %v1756_v20 = vsub.f32 %v1724_v37, %v1744_v19 }
 0x28b   :  { %v3480_v21 = vpop.eup %3479  ;;  %v1767_v14 = vmul.f32 1.442695, %v1755_v11 }
 0x28c   :  { %v1769_v22 = vmul.f32 1.442695, %v1756_v20  ;;  %v1778_v23 = vsel %vm1324_vm2, %v3480_v21, 0.0 }
 0x28d   :  { %3485 = vpow2.f32 %v1767_v14  ;;  %1779 = vadd.xlane.f32.xlu1 %v1778_v23  ;;  %v1830_v14 = vpack.c.bf16 %v1303_v52, %v1303_v52  ;;  %v2208_v23 = vld [vmem:[%s4213_s8] sm:$0xf] }
 0x28e   :  { %3487 = vpow2.f32 %v1769_v22 }
 0x28f   :  { %v3482_v24 = vpop.eup %3481 }
 0x290   :  { %v1747_v25 = vpop.xlane.xlu0 %1746  ;;  %v1781_v26 = vsel %vm1324_vm2, %v3482_v24, 0.0 }
 0x291   :  { %v1750_v27 = vpop.xlane.xlu1 %1749  ;;  %v1757_v28 = vsub.f32 %v1725_v0, %v1747_v25  ;;  %1782 = vadd.xlane.f32.xlu0 %v1781_v26  ;;  %v2158_v25 = vsel %vm1834_vm3, %v1830_v14, 0 }
 0x292   :  { %v1758_v29 = vsub.f32 %v1726_v3, %v1750_v27  ;;  %v1826_v3 = vpack.c.bf16 %v1143_v60, %v1143_v60 }
 0x293   :  { %v3484_v30 = vpop.eup %3483  ;;  %v1771_v33 = vmul.f32 1.442695, %v1757_v28 }
 0x294   :  { %v1773_v34 = vmul.f32 1.442695, %v1758_v29  ;;  %v1784_v35 = vsel %vm1324_vm2, %v3484_v30, 0.0  ;;  %v1974_v6 = vsel %vm1834_vm3, %v1826_v3, 0  ;;  %v2216_v29 = vsel %vm1834_vm3, %v2208_v23, 0 }
 0x295   :  { %3489 = vpow2.f32 %v1771_v33  ;;  %1785 = vadd.xlane.f32.xlu1 %v1784_v35  ;;  %v2209_v33 = vld [vmem:[%s4213_s8 + $0x4] sm:$0xf]  ;;  %v2210_v35 = vld [vmem:[%s4213_s8 + $0x8] sm:$0xf] }
 0x296   :  { %3491 = vpow2.f32 %v1773_v34  ;;  %v2262_v34 = vsel %vm1834_vm3, %v2209_v33, 0 }
 0x297   :  { %v3999_v36 = vpop.eup %3485 }
 0x298   :  { %v4001_v38 = vpop.eup %3487  ;;  %v1787_v40 = vsel %vm1324_vm2, %v3999_v36, 0.0 }
 0x299   :  { %v1790_v41 = vsel %vm1324_vm2, %v4001_v38, 0.0  ;;  %1788 = vadd.xlane.f32.xlu0 %v1787_v40 }
 0x29a   :  { %1791 = vadd.xlane.f32.xlu1 %v1790_v41  ;;  %v2308_v41 = vsel %vm1834_vm3, %v2210_v35, 0 }
 0x29f   :  { %v4007_v43 = vpop.eup %3489 }
 0x2a0   :  { %v4009_v44 = vpop.eup %3491  ;;  %v1793_v46 = vsel %vm1324_vm2, %v4007_v43, 0.0 }
 0x2a1   :  { %v1796_v48 = vsel %vm1324_vm2, %v4009_v44, 0.0  ;;  %1794 = vadd.xlane.f32.xlu0 %v1793_v46 }
 0x2a2   :  { %1797 = vadd.xlane.f32.xlu1 %v1796_v48 }
 0x316   :  { %v1777_v37 = vpop.xlane.xlu0 %1776 }
 0x317   :  { %3493 = vrcp.f32 %v1777_v37 }
 0x31a   :  { %v1780_v50 = vpop.xlane.xlu1 %1779 }
 0x31b   :  { %3495 = vrcp.f32 %v1780_v50 }
 0x31e   :  { %v1783_v56 = vpop.xlane.xlu0 %1782 }
 0x31f   :  { %3497 = vrcp.f32 %v1783_v56 }
 0x321   :  { %v3494_v58 = vpop.eup %3493 }
 0x322   :  { %v1807_v61 = vmul.f32 %v3494_v58, %v3478_v53  ;;  %v1786_v62 = vpop.xlane.xlu1 %1785 }
 0x323   :  { %3499 = vrcp.f32 %v1786_v62 }
 0x324   :  { %v1815_v63 = vpack.c.bf16 %v1807_v61, %v1807_v61 }
 0x325   :  { %v3496_v0 = vpop.eup %3495 }
 0x326   :  { %v1808_v4 = vmul.f32 %v3496_v0, %v3480_v21  ;;  %3329 = vmatmul.mubr.msk.bf16.vlgmr.msra.gmra.mrb[64].mxu0 %vm1324_vm2, %v1815_v63  ;;  %v1789_v32 = vpop.xlane.xlu0 %1788  ;;  %v2112_v21 = vsel %vm1834_vm3, %v1829_v18, 0 }
 0x327   :  { %v1792_v45 = vpop.xlane.xlu1 %1791  ;;  %3339 = vmatpush3.bf16.msra.mxu0 %v1928_v2  ;;  %3501 = vrcp.f32 %v1789_v32  ;;  %3340 = vmatprep.mubr.msk.bf16.mxu0 %vm3544_vm0, %v3543_v1 }
 0x328   :  { %3503 = vrcp.f32 %v1792_v45  ;;  %v1816_v31 = vpack.c.bf16 %v1808_v4, %v1808_v4  ;;  %3350 = vmatprep.subr.bf16.mxu0 %v3543_v1 }
 0x329   :  { %v3498_v5 = vpop.eup %3497 }
 0x32a   :  { %v1809_v8 = vmul.f32 %v3498_v5, %v3482_v24  ;;  %3335 = vmatmul.mubr.msk.bf16.vlgmr.msra.gmra.mrb[64].mxu1 %vm1324_vm2, %v1816_v31 }
 0x32b   :  { %3345 = vmatpush3.bf16.msra.mxu1 %v1974_v6  ;;  %3346 = vmatprep.mubr.msk.bf16.mxu1 %vm3544_vm0, %v3543_v1 }
 0x32c   :  { %v1817_v9 = vpack.c.bf16 %v1809_v8, %v1809_v8  ;;  %3356 = vmatprep.subr.bf16.mxu1 %v3543_v1 }
 0x32d   :  { %v3500_v47 = vpop.eup %3499 }
 0x32e   :  { %v1810_v15 = vmul.f32 %v3500_v47, %v3484_v30  ;;  %3341 = vmatmul.mubr.msk.bf16.vlgmr.msra.gmra.mrb[68].mxu0 %vm1324_vm2, %v1817_v9  ;;  %v1795_v42 = vpop.xlane.xlu0 %1794 }
 0x32f   :  { %v1798_v16 = vpop.xlane.xlu1 %1797  ;;  %3351 = vmatpush3.bf16.msra.mxu0 %v2020_v10  ;;  %3505 = vrcp.f32 %v1795_v42  ;;  %3352 = vmatprep.mubr.msk.bf16.mxu0 %vm3544_vm0, %v3543_v1 }
 0x330   :  { %3507 = vrcp.f32 %v1798_v16  ;;  %v1818_v53 = vpack.c.bf16 %v1810_v15, %v1810_v15  ;;  %3362 = vmatprep.subr.bf16.mxu0 %v3543_v1 }
 0x331   :  { %v3502_v55 = vpop.eup %3501 }
 0x332   :  { %v3504_v17 = vpop.eup %3503  ;;  %v1811_v19 = vmul.f32 %v3502_v55, %v3999_v36  ;;  %3347 = vmatmul.mubr.msk.bf16.vlgmr.msra.gmra.mrb[68].mxu1 %vm1324_vm2, %v1818_v53 }
 0x333   :  { %3357 = vmatpush3.bf16.msra.mxu1 %v2066_v49  ;;  %3358 = vmatprep.mubr.msk.bf16.mxu1 %vm3544_vm0, %v3543_v1  ;;  %v1812_v11 = vmul.f32 %v3504_v17, %v4001_v38 }
 0x334   :  { %v1819_v20 = vpack.c.bf16 %v1811_v19, %v1811_v19  ;;  %3368 = vmatprep.subr.bf16.mxu1 %v3543_v1 }
 0x335   :  { %v1820_v39 = vpack.c.bf16 %v1812_v11, %v1812_v11 }
 0x336   :  { %3353 = vmatmul.mubr.msk.bf16.vlgmr.msra.gmra.mrb[72].mxu0 %vm1324_vm2, %v1819_v20 }
 0x337   :  { %3363 = vmatpush3.bf16.msra.mxu0 %v2112_v21  ;;  %3364 = vmatprep.mubr.msk.bf16.mxu0 %vm3544_vm0, %v3543_v1 }
 0x338   :  { %3374 = vmatprep.subr.bf16.mxu0 %v3543_v1 }
 0x339   :  { %v3506_v22 = vpop.eup %3505 }
 0x33a   :  { %v3508_v24 = vpop.eup %3507  ;;  %v1813_v26 = vmul.f32 %v3506_v22, %v4007_v43  ;;  %3359 = vmatmul.mubr.msk.bf16.vlgmr.msra.gmra.mrb[72].mxu1 %vm1324_vm2, %v1820_v39 }
 0x33b   :  { %3369 = vmatpush3.bf16.msra.mxu1 %v2158_v25  ;;  %3370 = vmatprep.mubr.msk.bf16.mxu1 %vm3544_vm0, %v3543_v1  ;;  %v1814_v27 = vmul.f32 %v3508_v24, %v4009_v44  ;;  %v2211_v44 = vld [vmem:[%s4213_s8 + $0xc] sm:$0xf] }
 0x33c   :  { %v1821_v28 = vpack.c.bf16 %v1813_v26, %v1813_v26  ;;  %3380 = vmatprep.subr.bf16.mxu1 %v3543_v1  ;;  %v2354_v51 = vsel %vm1834_vm3, %v2211_v44, 0 }
 0x33d   :  { %v1822_v30 = vpack.c.bf16 %v1814_v27, %v1814_v27 }
 0x33e   :  { %3365 = vmatmul.mubr.msk.bf16.vlgmr.msra.gmra.mrb[76].mxu0 %vm1324_vm2, %v1821_v28 }
 0x33f   :  { %3375 = vmatpush3.bf16.msra.mxu0 %v2216_v29  ;;  %3376 = vmatprep.mubr.msk.bf16.mxu0 %vm3544_vm0, %v3543_v1 }
 0x340   :  { %3386 = vmatprep.subr.bf16.mxu0 %v3543_v1 }
 0x342   :  { %3371 = vmatmul.mubr.msk.bf16.vlgmr.msra.gmra.mrb[76].mxu1 %vm1324_vm2, %v1822_v30 }
 0x343   :  { %3382 = vmatprep.mubr.msk.bf16.mxu1 %vm3544_vm0, %v3543_v1  ;;  %3381 = vmatpush3.bf16.msra.mxu1 %v2262_v34 }
 0x344   :  { %3392 = vmatprep.subr.bf16.mxu1 %v3543_v1 }
 0x3f9   :  { %v1872_v36 = vpop.f32.mrb[64].mxu0 }
 0x3fa   :  { %v2200_v38 = vpack.c.bf16 %v1872_v36, %v1872_v36  ;;  %v3330_v40 = vpop.f32.mrb[65].mxu0  ;;  %v2943_v36 = vld [vmem:[%s4214_s9] ss:$0 sm:$0xff]  ;;  %s3545_s9 = smov [#allocation2]  }
 0x3fb   :  { %v1875_v43 = vpop.f32.mrb[66].mxu0  ;;  %s2848_s22 = sshll.u32 %s3545_s9, 4  ;;  %s2849_s22 = int_to_ptr.vmem [resolvable:$true] %s2848_s22 }
 0x3fc   :  { %v3331_v46 = vpop.f32.mrb[67].mxu0  ;;  %3377 = vmatmul.mubr.msk.bf16.vlgmr.msra.gmra.mrb[80].mxu0 %vm1324_vm2, %v2200_v38  ;;  %p3524_p1 = scmp.lt.s32.totalorder %s2849_s22, %s2849_s22 }
 0x3fd   :  { %v1918_v48 = vpop.f32.mrb[64].mxu1  ;;  %3387 = vmatpush3.bf16.msra.mxu0 %v2308_v41  ;;  %3388 = vmatprep.mubr.msk.bf16.mxu0 %vm3544_vm0, %v3543_v1 }
 0x3fe   :  { %v2201_v37 = vpack.c.bf16 %v1918_v48, %v1918_v48  ;;  %v3336_v50 = vpop.f32.mrb[65].mxu1  ;;  %3398 = vmatprep.subr.bf16.mxu0 %v3543_v1 }
 0x3ff   :  { %v1921_v54 = vpop.f32.mrb[66].mxu1 }
 0x400   :  { %v3337_v56 = vpop.f32.mrb[67].mxu1  ;;  %3383 = vmatmul.mubr.msk.bf16.vlgmr.msra.gmra.mrb[80].mxu1 %vm1324_vm2, %v2201_v37 }
 0x401   :  { %v1964_v57 = vpop.f32.mrb[68].mxu0  ;;  %3393 = vmatpush3.bf16.msra.mxu1 %v2354_v51  ;;  %3394 = vmatprep.mubr.msk.bf16.mxu1 %vm3544_vm0, %v3543_v1 }
 0x402   :  { %v2202_v58 = vpack.c.bf16 %v1964_v57, %v1964_v57  ;;  %v3342_v59 = vpop.f32.mrb[69].mxu0  ;;  %3404 = vmatprep.subr.bf16.mxu1 %v3543_v1 }
 0x403   :  { %v1967_v60 = vpop.f32.mrb[70].mxu0 }
 0x404   :  { %v3343_v61 = vpop.f32.mrb[71].mxu0  ;;  %3389 = vmatmul.mubr.msk.bf16.vlgmr.msra.gmra.mrb[84].mxu0 %vm1324_vm2, %v2202_v58 }
 0x405   :  { %v2010_v62 = vpop.f32.mrb[68].mxu1  ;;  %3399 = vmatpush3.bf16.msra.mxu0 %v2216_v29  ;;  %3400 = vmatprep.mubr.msk.bf16.mxu0 %vm3544_vm0, %v3543_v1 }
 0x406   :  { %v2203_v63 = vpack.c.bf16 %v2010_v62, %v2010_v62  ;;  %v3348_v0 = vpop.f32.mrb[69].mxu1  ;;  %3410 = vmatprep.subr.bf16.mxu0 %v3543_v1 }
 0x407   :  { %v2013_v2 = vpop.f32.mrb[70].mxu1 }
 0x408   :  { %v3349_v3 = vpop.f32.mrb[71].mxu1  ;;  %3395 = vmatmul.mubr.msk.bf16.vlgmr.msra.gmra.mrb[84].mxu1 %vm1324_vm2, %v2203_v63 }
 0x409   :  { %v2056_v4 = vpop.f32.mrb[72].mxu0  ;;  %3405 = vmatpush3.bf16.msra.mxu1 %v2262_v34  ;;  %3406 = vmatprep.mubr.msk.bf16.mxu1 %vm3544_vm0, %v3543_v1 }
 0x40a   :  { %v2204_v32 = vpack.c.bf16 %v2056_v4, %v2056_v4  ;;  %v3354_v45 = vpop.f32.mrb[73].mxu0  ;;  %3416 = vmatprep.subr.bf16.mxu1 %v3543_v1 }
 0x40b   :  { %v2059_v31 = vpop.f32.mrb[74].mxu0 }
 0x40c   :  { %v3355_v5 = vpop.f32.mrb[75].mxu0  ;;  %3401 = vmatmul.mubr.msk.bf16.vlgmr.msra.gmra.mrb[88].mxu0 %vm1324_vm2, %v2204_v32 }
 0x40d   :  { %v2102_v6 = vpop.f32.mrb[72].mxu1  ;;  %3411 = vmatpush3.bf16.msra.mxu0 %v2308_v41  ;;  %3412 = vmatprep.mubr.msk.bf16.mxu0 %vm3544_vm0, %v3543_v1 }
 0x40e   :  { %v2205_v7 = vpack.c.bf16 %v2102_v6, %v2102_v6  ;;  %v3360_v8 = vpop.f32.mrb[73].mxu1  ;;  %3422 = vmatprep.subr.bf16.mxu0 %v3543_v1 }
 0x40f   :  { %v2105_v9 = vpop.f32.mrb[74].mxu1 }
 0x410   :  { %v3361_v47 = vpop.f32.mrb[75].mxu1  ;;  %3407 = vmatmul.mubr.msk.bf16.vlgmr.msra.gmra.mrb[88].mxu1 %vm1324_vm2, %v2205_v7 }
 0x411   :  { %v2148_v10 = vpop.f32.mrb[76].mxu0  ;;  %3417 = vmatpush3.bf16.msra.mxu1 %v2354_v51  ;;  %3418 = vmatprep.mubr.msk.bf16.mxu1 %vm3544_vm0, %v3543_v1 }
 0x412   :  { %v2206_v12 = vpack.c.bf16 %v2148_v10, %v2148_v10  ;;  %v3366_v13 = vpop.f32.mrb[77].mxu0  ;;  %3430 = vmatprep.subr.bf16.mxu1 %v3543_v1 }
 0x413   :  { %v2151_v15 = vpop.f32.mrb[78].mxu0 }
 0x414   :  { %v3367_v42 = vpop.f32.mrb[79].mxu0  ;;  %3413 = vmatmul.mubr.msk.bf16.vlgmr.msra.gmra.mrb[92].mxu0 %vm1324_vm2, %v2206_v12 }
 0x415   :  { %v2194_v16 = vpop.f32.mrb[76].mxu1  ;;  %3426 = vmatprep.mubr.msk.bf16.mxu0 %vm3544_vm0, %v3543_v1 }
 0x416   :  { %v2207_v53 = vpack.c.bf16 %v2194_v16, %v2194_v16  ;;  %v3372_v55 = vpop.f32.mrb[77].mxu1 }
 0x417   :  { %v2197_v17 = vpop.f32.mrb[78].mxu1 }
 0x418   :  { %v3373_v49 = vpop.f32.mrb[79].mxu1  ;;  %3419 = vmatmul.mubr.msk.bf16.vlgmr.msra.gmra.mrb[92].mxu1 %vm1324_vm2, %v2207_v53  ;;  %v3471_v17 = vld [vmem:[%s4217_s12] sm:$0xff]  }
 0x419   :  { %3438 = vmatprep.mubr.msk.bf16.mxu1 %vm3544_vm0, %v3543_v1  ;;  %3423 = vmatpush3.bf16.msra.mxu0 %v3471_v17  ;;  %v3472_v49 = vld [vmem:[%s4217_s12 + $0x8] sm:$0xff]  }
 0x41a   :  { %3424 = vmatprep.subr.bf16.mxu0 %v3543_v1 }
 0x41d   :  { %3425 = vmatpush3.bf16.msra.mxu0 %v3472_v49 }
 0x4cf   :  { %v2252_v18 = vpop.f32.mrb[80].mxu0 }
 0x4d0   :  { %v3378_v52 = vpop.f32.mrb[81].mxu0  ;;  %v2568_v21 = vsel %vm121_vm1, %v2252_v18, 0.0  ;;  %v3473_v18 = vld [vmem:[%s4219_s14] sm:$0xff]  }
 0x4d1   :  { %v2255_v19 = vpop.f32.mrb[82].mxu0  ;;  %3431 = vmatpush3.bf16.msra.mxu1 %v3473_v18  ;;  %v3474_v52 = vld [vmem:[%s4219_s14 + $0x8] sm:$0xff]   ;;  %v2957_v18 = vld [vmem:[%s4222_s17] ss:$0 sm:$0xff] }
 0x4d2   :  { %v3379_v11 = vpop.f32.mrb[83].mxu0  ;;  %3432 = vmatprep.subr.bf16.mxu1 %v3543_v1 }
 0x4d3   :  { %v2298_v20 = vpop.f32.mrb[80].mxu1 }
 0x4d4   :  { %v2569_v14 = vsel %vm121_vm1, %v2298_v20, 0.0  ;;  %v3384_v39 = vpop.f32.mrb[81].mxu1 }
 0x4d5   :  { %v2570_v22 = vadd.f32 %v2569_v14, %v2568_v21  ;;  %v2301_v23 = vpop.f32.mrb[82].mxu1  ;;  %3433 = vmatpush3.bf16.msra.mxu1 %v3474_v52 }
 0x4d6   :  { %v3385_v24 = vpop.f32.mrb[83].mxu1  ;;  %3434 = vmatprep.subr.bf16.mxu1 %v3543_v1 }
 0x4d7   :  { %v2344_v25 = vpop.f32.mrb[84].mxu0  ;;  %v2944_v24 = vld [vmem:[%s4215_s10] ss:$0 sm:$0xff] }
 0x4d8   :  { %v2571_v26 = vsel %vm121_vm1, %v2344_v25, 0.0  ;;  %v3390_v27 = vpop.f32.mrb[85].mxu0 }
 0x4d9   :  { %v2572_v28 = vadd.f32 %v2571_v26, %v2570_v22  ;;  %v2347_v29 = vpop.f32.mrb[86].mxu0  ;;  %v2945_v27 = vld [vmem:[%s4216_s11] ss:$0 sm:$0xff] }
 0x4da   :  { %v3391_v30 = vpop.f32.mrb[87].mxu0 }
 0x4db   :  { %v2390_v33 = vpop.f32.mrb[84].mxu1 }
 0x4dc   :  { %v2573_v34 = vsel %vm121_vm1, %v2390_v33, 0.0  ;;  %v3396_v35 = vpop.f32.mrb[85].mxu1 }
 0x4dd   :  { %v2574_v38 = vadd.f32 %v2573_v34, %v2572_v28  ;;  %v2393_v40 = vpop.f32.mrb[86].mxu1  ;;  %v3517_v34 = vld [vmem:[%s4231_s23] sm:$0xff] }
 0x4de   :  { %v3397_v41 = vpop.f32.mrb[87].mxu1 }
 0x4df   :  { %v2433_v43 = vpop.f32.mrb[88].mxu0  ;;  %v2589_v44 = vadd.f32 %v2943_v36, %v2574_v38  ;;  %v3475_v41 = vld [vmem:[%s4219_s14 + $0x10] sm:$0xff]  }
 0x4e0   :  { %v3402_v46 = vpop.f32.mrb[89].mxu0  ;;  %v2575_v54 = vsel %vm121_vm1, %v2433_v43, 0.0  ;;  %3435 = vmatpush3.bf16.msra.mxu1 %v3475_v41  ;;  %v3476_v43 = vld [vmem:[%s4219_s14 + $0x18] sm:$0xff]  }
 0x4e1   :  { %v2436_v48 = vpop.f32.mrb[90].mxu0  ;;  %v2593_v37 = vsel %vm121_vm1, %v2589_v44, 0.0  ;;  %3436 = vmatprep.subr.bf16.mxu1 %v3543_v1  ;;  %v2950_v1 = vld [vmem:[%s4220_s15] ss:$0 sm:$0xff] }
 0x4e2   :  { %2594 = vadd.xlane.f32.xlu0 %v2593_v37  ;;  %v3403_v50 = vpop.f32.mrb[91].mxu0 }
 0x4e3   :  { %v2476_v51 = vpop.f32.mrb[88].mxu1 }
 0x4e4   :  { %v2576_v56 = vsel %vm121_vm1, %v2476_v51, 0.0  ;;  %v3408_v57 = vpop.f32.mrb[89].mxu1  ;;  %3437 = vmatpush3.bf16.msra.mxu1 %v3476_v43 }
 0x4e5   :  { %v2577_v58 = vadd.f32 %v2576_v56, %v2575_v54  ;;  %v2479_v59 = vpop.f32.mrb[90].mxu1 }
 0x4e6   :  { %v3409_v60 = vpop.f32.mrb[91].mxu1 }
 0x4e7   :  { %v2519_v61 = vpop.f32.mrb[92].mxu0 }
 0x4e8   :  { %v2578_v62 = vsel %vm121_vm1, %v2519_v61, 0.0  ;;  %v3414_v63 = vpop.f32.mrb[93].mxu0 }
 0x4e9   :  { %v2579_v0 = vadd.f32 %v2578_v62, %v2577_v58  ;;  %v2522_v2 = vpop.f32.mrb[94].mxu0 }
 0x4ea   :  { %v3415_v3 = vpop.f32.mrb[95].mxu0 }
 0x4eb   :  { %v2562_v4 = vpop.f32.mrb[92].mxu1 }
 0x4ec   :  { %v2580_v32 = vsel %vm121_vm1, %v2562_v4, 0.0  ;;  %v3420_v45 = vpop.f32.mrb[93].mxu1 }
 0x4ed   :  { %v2581_v31 = vadd.f32 %v2580_v32, %v2579_v0  ;;  %v2565_v5 = vpop.f32.mrb[94].mxu1 }
 0x4ee   :  { %v3421_v6 = vpop.f32.mrb[95].mxu1 }
 0x4ef   :  { %v2590_v7 = vadd.f32 %v2943_v36, %v2581_v31  ;;  %v3518_v36 = vld [vmem:[%s4231_s23 + $0x8] sm:$0xff] }
 0x4f1   :  { %v2596_v8 = vsel %vm121_vm1, %v2590_v7, 0.0 }
 0x4f2   :  { %2597 = vadd.xlane.f32.xlu1 %v2596_v8 }
 0x56f   :  { %v2595_v9 = vpop.xlane.xlu0 %2594 }
 0x570   :  { %v2600_v47 = vmul.f32 0.03125, %v2595_v9 }
 0x572   :  { %v2602_v10 = vsub.f32 %v2589_v44, %v2600_v47  ;;  %v2946_v44 = vld [vmem:[%s4218_s13] ss:$0 sm:$0xff] }
 0x574   :  { %v2604_v12 = vmul.f32 %v2602_v10, %v2602_v10 }
 0x576   :  { %v2606_v13 = vsel %vm121_vm1, %v2604_v12, 0.0 }
 0x577   :  { %2607 = vadd.xlane.f32.xlu0 %v2606_v13 }
 0x57f   :  { %v2598_v15 = vpop.xlane.xlu1 %2597 }
 0x580   :  { %v2601_v42 = vmul.f32 0.03125, %v2598_v15 }
 0x582   :  { %v2603_v16 = vsub.f32 %v2590_v7, %v2601_v42 }
 0x584   :  { %v2605_v53 = vmul.f32 %v2603_v16, %v2603_v16 }
 0x586   :  { %v2609_v55 = vsel %vm121_vm1, %v2605_v53, 0.0 }
 0x587   :  { %2610 = vadd.xlane.f32.xlu1 %v2609_v55  ;;  %v2956_v55 = vld [vmem:[%s4221_s16] ss:$0 sm:$0xff]  ;;  %s3519_s16 = scalar_lea.vmem %s2849_s22, 256 }
 0x588   :  { %p3520_p0 = scmp.ne.s32.totalorder %s2849_s22, %s3519_s16  ;;  %p3525_p2 = scmp.lt.s32.totalorder %s3519_s16, %s3519_s16 }
 0x58a   :  { %p3526_p3 = por %p3525_p2, %p3524_p1 }
 0x58c   :  { %p3527_p4 = pnand %p3526_p3, %p3520_p0 }
 0x604   :  { %v2608_v19 = vpop.xlane.xlu0 %2607 }
 0x605   :  { %v2612_v11 = vmul.f32 0.03125, %v2608_v19 }
 0x607   :  { %v2614_v20 = vadd.f32 1e-05, %v2612_v11 }
 0x609   :  { %3509 = vrsqrt.f32 %v2614_v20 }
 0x613   :  { %v3510_v22 = vpop.eup %3509 }
 0x614   :  { %v2611_v21 = vpop.xlane.xlu1 %2610  ;;  %v2618_v23 = vmul.f32 %v3510_v22, %v2602_v10 }
 0x615   :  { %v2613_v14 = vmul.f32 0.03125, %v2611_v21 }
 0x616   :  { %v2626_v25 = vmul.f32 %v2944_v24, %v2618_v23 }
 0x617   :  { %v2615_v39 = vadd.f32 1e-05, %v2613_v14 }
 0x618   :  { %v2634_v30 = vadd.f32 %v2945_v27, %v2626_v25 }
 0x619   :  { %3511 = vrsqrt.f32 %v2615_v39 }
 0x61a   :  { %v4156_v35 = vadd.f32 %v3517_v34, %v2634_v30 }
 0x623   :  { %v3512_v26 = vpop.eup %3511 }
 0x624   :  { %v2619_v28 = vmul.f32 %v3512_v26, %v2603_v16 }
 0x626   :  { %v2627_v29 = vmul.f32 %v2944_v24, %v2619_v28 }
 0x628   :  { %v2635_v33 = vadd.f32 %v2945_v27, %v2627_v29 }
 0x62a   :  { %v4161_v38 = vadd.f32 %v3518_v36, %v2635_v33 }
 0x62c   :  { %v2638_v40 = vpack.c.bf16 %v4161_v38, %v4156_v35 }
 0x62e   :  { %3427 = vmatmul.mubr.msk.bf16.vlgmr.msra.gmra.mrb[96].mxu0 %vm121_vm1, %v2638_v40 }
 0x701   :  { %v2699_v46 = vpop.f32.mrb[96].mxu0 }
 0x702   :  { %v2700_v48 = vadd.f32 %v2946_v44, %v2699_v46  ;;  %v3428_v37 = vpop.f32.mrb[97].mxu0 }
 0x703   :  { %v2702_v50 = vpop.f32.mrb[98].mxu0 }
 0x704   :  { %v2703_v51 = vadd.f32 %v2946_v44, %v2702_v50  ;;  %v3429_v54 = vpop.f32.mrb[99].mxu0  ;;  %v2706_v56 = vmax.f32 %v2700_v48, 0.0 }
 0x706   :  { %v2707_v57 = vmax.f32 %v2703_v51, 0.0 }
 0x708   :  { %v2708_v58 = vpack.c.bf16 %v2707_v57, %v2706_v56 }
 0x70a   :  { %3439 = vmatmul.mubr.msk.bf16.vlgmr.msra.gmra.mrb[96].mxu1 %vm2748_vm6, %v2708_v58 }
 0x7dd   :  { %v2786_v59 = vpop.f32.mrb[96].mxu1 }
 0x7de   :  { %v2787_v60 = vadd.f32 %v2950_v1, %v2786_v59  ;;  %v3440_v61 = vpop.f32.mrb[97].mxu1 }
 0x7df   :  { %v2789_v62 = vpop.f32.mrb[98].mxu1 }
 0x7e0   :  { %v2790_v63 = vadd.f32 %v2950_v1, %v2789_v62  ;;  %v3441_v0 = vpop.f32.mrb[99].mxu1  ;;  %v2795_v2 = vsel %vm121_vm1, %v2787_v60, 0.0 }
 0x7e1   :  { %2796 = vadd.xlane.f32.xlu0 %v2795_v2 }
 0x7e2   :  { %v2798_v3 = vsel %vm121_vm1, %v2790_v63, 0.0 }
 0x7e3   :  { %2799 = vadd.xlane.f32.xlu1 %v2798_v3 }
 0x86e   :  { %v2797_v4 = vpop.xlane.xlu0 %2796 }
 0x86f   :  { %v2801_v32 = vmul.f32 0.03125, %v2797_v4 }
 0x870   :  { %v2800_v45 = vpop.xlane.xlu1 %2799 }
 0x871   :  { %v2803_v31 = vsub.f32 %v2787_v60, %v2801_v32  ;;  %v2802_v5 = vmul.f32 0.03125, %v2800_v45 }
 0x873   :  { %v2804_v6 = vsub.f32 %v2790_v63, %v2802_v5  ;;  %v2805_v7 = vmul.f32 %v2803_v31, %v2803_v31 }
 0x875   :  { %v2807_v8 = vsel %vm121_vm1, %v2805_v7, 0.0  ;;  %v2806_v9 = vmul.f32 %v2804_v6, %v2804_v6 }
 0x876   :  { %2808 = vadd.xlane.f32.xlu0 %v2807_v8 }
 0x877   :  { %v2810_v47 = vsel %vm121_vm1, %v2806_v9, 0.0 }
 0x878   :  { %2811 = vadd.xlane.f32.xlu1 %v2810_v47 }
 0x903   :  { %v2809_v10 = vpop.xlane.xlu0 %2808 }
 0x904   :  { %v2813_v12 = vmul.f32 0.03125, %v2809_v10 }
 0x905   :  { %v2812_v13 = vpop.xlane.xlu1 %2811 }
 0x906   :  { %v2815_v15 = vadd.f32 1e-05, %v2813_v12  ;;  %v2814_v42 = vmul.f32 0.03125, %v2812_v13 }
 0x908   :  { %3513 = vrsqrt.f32 %v2815_v15  ;;  %v2816_v16 = vadd.f32 1e-05, %v2814_v42 }
 0x90a   :  { %3515 = vrsqrt.f32 %v2816_v16 }
 0x912   :  { %v3514_v53 = vpop.eup %3513 }
 0x913   :  { %v2819_v17 = vmul.f32 %v3514_v53, %v2803_v31 }
 0x914   :  { %v3516_v49 = vpop.eup %3515 }
 0x915   :  { %v2827_v52 = vmul.f32 %v2956_v55, %v2819_v17  ;;  %v2820_v19 = vmul.f32 %v3516_v49, %v2804_v6 }
 0x917   :  { %v2828_v11 = vmul.f32 %v2956_v55, %v2820_v19  ;;  %v2835_v20 = vadd.f32 %v2957_v18, %v2827_v52 }
 0x919   :  { %v2836_v21 = vadd.f32 %v2957_v18, %v2828_v11  ;;  %v2837_v14 = vadd.f32 %v2835_v20, %v4156_v35 }
 0x91b   :  { %v2838_v39 = vadd.f32 %v2836_v21, %v4161_v38  ;;  %v2839_v22 = vsel %vm121_vm1, %v2837_v14, 0.0 }
 0x91c   :  { %2841 = vst [vmem:[#allocation2] sm:$0xff] %v2839_v22 }
 0x91d   :  { %v2840_v23 = vsel %vm121_vm1, %v2838_v39, 0.0 }
 0x91e   :  { %2842 = vst [vmem:[#allocation2 + $0x8] sm:$0xff] %v2840_v23 }
 0x91f   :  { %3530 = shalt.err (!%p3527_p4)
}
 0x920   :  { %s3531_s24 = scalar_lea.hbm %s4223_s18, 256 }
 0x921   :  { %p3532_p5 = scmp.ne.s32.totalorder %s4223_s18, %s3531_s24  ;;  %p3535_p6 = scmp.lt.u32.totalorder %s3531_s24, %s4223_s18 }
 0x923   :  { %p3537_p7 = pnand %p3535_p6, %p3532_p5 }
 0x925   :  { %3540 = shalt.err (!%p3537_p7)
}
 0x926   :  { %s3546_s12 = smov 128   ;;  %s3547_s30 = smov 8  }
 0x927   :  { %2854 = dma.vmem_to_hbm [thread:$0]  %s2849_s22, 256, %s4223_s18, [#allocation3], %s3546_s12, %s3546_s12, %s3547_s30  }
 0x928   :  { %3541 = dma.done.wait [#allocation3], 256  }
 0x929   :  { %3542 = vsyncadd [#allocation3], 4294967040 }
 0x92a   :  { %2858 = vsyncpa [#allocation3], 1 }

</bundles_post_ra>
